<compile_context>
chip_gen: v6e
topology: v6e:2x2x1
jax: 0.10.0
libtpu: 0.0.40
codegen_flags: <defaults>
</compile_context>

<pallas_src>
from functools import partial

import jax
import jax.numpy as jnp
from jax.experimental import pallas as pl
from jax.experimental.pallas import tpu as pltpu


# ----------------------------------------------------------------------------
# Pallas kernel: one bidirectional LSTM layer (both directions fused)
# ----------------------------------------------------------------------------
def bilstm_layer_kernel(xcat_ref, wih_ref, whh_ref, b_ref, out_ref, g_scr,
                        *, seq_len, batch, hidden):
    """xcat_ref: (L*B, 2*Din) time-major flattened [x | reversed_x] per row.
    wih_ref/(2*Din,8H), whh_ref/(2H,8H), b_ref/(1,8H): block-diag interleaved.
    out_ref: (L*B, 2H); lanes [:H] = fw hidden, lanes [H:] = bw hidden
    (bw is in reversed-time order; un-reversed in the wrapper)."""
    H = hidden
    H2 = 2 * H

    # --- Hoisted, batched input projection for BOTH directions -------------
    # One big (L*B, 2Din) @ (2Din, 8H) MXU matmul instead of 2*L tiny ones;
    # the 8H = 256-lane result is written lane-dense to scratch once.
    g_scr[...] = jnp.dot(xcat_ref[...], wih_ref[...],
                         preferred_element_type=jnp.float32) + b_ref[...]

    # Keep the recurrent weight resident in vregs across the whole loop.
    whh = whh_ref[...]                      # (2H, 8H)

    def step(t, carry):
        h, c = carry                        # (B, 2H) each: [fw | bw]
        row0 = t * batch
        if not isinstance(t, int):          # dynamic trip (fori_loop path)
            row0 = pl.multiple_of(row0, batch)
        rows = pl.ds(row0, batch)

        # One recurrent matmul drives both directions (block-diagonal whh).
        gates = g_scr[rows, :] + jnp.dot(h, whh,
                                         preferred_element_type=jnp.float32)

        # Gate layout: [i_f|i_b | f_f|f_b | g_f|g_b | o_f|o_b], each 2H wide,
        # so the elementwise cell runs once for both directions.
        i = jax.nn.sigmoid(gates[:, 0 * H2:1 * H2])
        f = jax.nn.sigmoid(gates[:, 1 * H2:2 * H2])
        g = jnp.tanh(gates[:, 2 * H2:3 * H2])
        o = jax.nn.sigmoid(gates[:, 3 * H2:4 * H2])
        c = f * c + i * g
        h = o * jnp.tanh(c)

        out_ref[rows, :] = h                # single 2H-lane store per step
        return h, c

    # PyTorch default h0 = c0 = 0; state lives in registers (loop carry).
    carry = (jnp.zeros((batch, H2), jnp.float32),
             jnp.zeros((batch, H2), jnp.float32))

    if seq_len <= 32:
        # Full unroll: static slice offsets, whole recurrence visible to LLO.
        for t in range(seq_len):
            carry = step(t, carry)
    else:
        jax.lax.fori_loop(0, seq_len, step, carry)


def bilstm_layer_pallas(inp, rev_inp, wih_c, whh_c, b_c):
    """inp, rev_inp: (L, B, Din).  Returns (L, B, 2H): lanes [:H] are the fw
    hidden states, lanes [H:] the bw hidden states in reversed-time order."""
    L, B, Din = inp.shape
    H2 = whh_c.shape[0]                                  # 2H
    xcat = jnp.concatenate([inp, rev_inp], axis=-1).reshape(L * B, 2 * Din)

    out = pl.pallas_call(
        partial(bilstm_layer_kernel, seq_len=L, batch=B, hidden=H2 // 2),
        out_shape=jax.ShapeDtypeStruct((L * B, H2), jnp.float32),
        scratch_shapes=[
            pltpu.VMEM((L * B, 4 * H2), jnp.float32),    # hoisted input gates
        ],
    )(xcat, wih_c, whh_c, b_c)
    return out.reshape(L, B, H2)


# ----------------------------------------------------------------------------
# Wrapper: full CudnnRnn forward
# ----------------------------------------------------------------------------
def reverse_padded_sequence(x, lengths):
    """x: (L, B, D); lengths: (B,). Reverses the valid prefix of each sequence,
    leaving padding positions in place (== lele.reverse_padded_sequence)."""
    L = x.shape[0]
    t = jnp.arange(L, dtype=jnp.int32)[:, None]               # (L, 1)
    ln = lengths[None, :]                                      # (1, B)
    idx = jnp.where(t < ln, ln - 1 - t, t)                     # (L, B)
    idx = jnp.broadcast_to(idx[:, :, None], x.shape)
    return jnp.take_along_axis(x, idx, axis=0)


def combine_bilstm_params(wih_f, whh_f, b_f, wih_b, whh_b, b_b):
    """Fold one layer's fw/bw LSTM weights into block-diagonal, per-gate
    interleaved matrices so a single matmul drives both directions.
    Inputs:  wih_* (Din, 4H), whh_* (H, 4H), b_* (1, 4H)  (torch gate order).
    Outputs: wih_c (2Din, 8H), whh_c (2H, 8H), b_c (1, 8H)."""
    H = whh_f.shape[0]

    def block_diag(w_f, w_b):
        K = w_f.shape[0]
        wf = w_f.reshape(K, 4, H)
        wb = w_b.reshape(K, 4, H)
        top = jnp.concatenate([wf, jnp.zeros_like(wf)], axis=-1)   # fw rows
        bot = jnp.concatenate([jnp.zeros_like(wb), wb], axis=-1)   # bw rows
        return jnp.concatenate([top, bot], axis=0).reshape(2 * K, 8 * H)

    wih_c = block_diag(wih_f, wih_b)
    whh_c = block_diag(whh_f, whh_b)
    b_c = jnp.concatenate([b_f.reshape(1, 4, H), b_b.reshape(1, 4, H)],
                          axis=-1).reshape(1, 8 * H)
    return wih_c, whh_c, b_c


@partial(jax.jit, static_argnames=("concat_layers",))
def cudnn_rnn_pallas(x, x_mask, params, concat_layers=False):
    """x: (B, L, D); x_mask: (B, L) with 1 = padding. params: list of
    (wih_c, whh_c, b_c) per layer from combine_bilstm_params."""
    # TODO(synk): recurrent/variational dropout (fw_masks / bw_masks,
    # dropout_output) omitted -- module defaults dropout_rate=0 (inference
    # path); rnn_type=GRU variant not implemented.
    x_t = jnp.transpose(x, (1, 0, 2))                           # (L, B, D)
    length = jnp.sum(1 - x_mask, axis=1).astype(jnp.int32)      # (B,)

    outputs = []
    inp = x_t
    for (wih_c, whh_c, b_c) in params:
        H = whh_c.shape[0] // 2
        rev_inp = reverse_padded_sequence(inp, length)
        comb = bilstm_layer_pallas(inp, rev_inp, wih_c, whh_c, b_c)
        fw = comb[:, :, :H]
        bw = reverse_padded_sequence(comb[:, :, H:], length)
        inp = jnp.concatenate([fw, bw], axis=2)                 # (L, B, 2H)
        outputs.append(inp)

    out = jnp.concatenate(outputs, axis=2) if concat_layers else outputs[-1]
    return jnp.transpose(out, (1, 0, 2))                        # (B, L, *)


# ----------------------------------------------------------------------------
# Plain-JAX reference (mirrors the PyTorch forward, per-direction weights)
# ----------------------------------------------------------------------------
def _lstm_ref(x_seq, wih, whh, b):
    H = whh.shape[0]
    B = x_seq.shape[1]

    def step(carry, x_t):
        h, c = carry
        gates = x_t @ wih + h @ whh + b[0]
        i = jax.nn.sigmoid(gates[:, 0 * H:1 * H])
        f = jax.nn.sigmoid(gates[:, 1 * H:2 * H])
        g = jnp.tanh(gates[:, 2 * H:3 * H])
        o = jax.nn.sigmoid(gates[:, 3 * H:4 * H])
        c = f * c + i * g
        h = o * jnp.tanh(c)
        return (h, c), h

    init = (jnp.zeros((B, H), jnp.float32), jnp.zeros((B, H), jnp.float32))
    _, hs = jax.lax.scan(step, init, x_seq)
    return hs


def cudnn_rnn_ref(x, x_mask, params, concat_layers=False):
    x_t = jnp.transpose(x, (1, 0, 2))
    length = jnp.sum(1 - x_mask, axis=1).astype(jnp.int32)
    outputs = []
    inp = x_t
    for (wih_f, whh_f, b_f, wih_b, whh_b, b_b) in params:
        fw = _lstm_ref(inp, wih_f, whh_f, b_f)
        rev = reverse_padded_sequence(inp, length)
        bw = _lstm_ref(rev, wih_b, whh_b, b_b)
        bw = reverse_padded_sequence(bw, length)
        inp = jnp.concatenate([fw, bw], axis=2)
        outputs.append(inp)
    out = jnp.concatenate(outputs, axis=2) if concat_layers else outputs[-1]
    return jnp.transpose(out, (1, 0, 2))


# ----------------------------------------------------------------------------
# Demo / self-check
# ----------------------------------------------------------------------------
if __name__ == "__main__":
    B, L = 2, 8
    D_in, H, num_layers = 32, 32, 2

    key = jax.random.PRNGKey(0)
    keys = jax.random.split(key, 2 + 6 * num_layers)

    x = jax.random.normal(keys[0], (B, L, D_in), dtype=jnp.float32)
    # variable lengths: full for batch 0, last two positions padded for batch 1
    lengths = jnp.array([L, L - 2], dtype=jnp.int32)
    pos = jnp.arange(L)[None, :]
    x_mask = (pos >= lengths[:, None]).astype(jnp.int32)        # (B, L), 1 = pad

    scale = 0.2
    raw_params, comb_params = [], []
    k = 2
    for layer in range(num_layers):
        din = D_in if layer == 0 else 2 * H
        wih_f = jax.random.normal(keys[k + 0], (din, 4 * H), jnp.float32) * scale
        whh_f = jax.random.normal(keys[k + 1], (H, 4 * H), jnp.float32) * scale
        b_f = jax.random.normal(keys[k + 2], (1, 4 * H), jnp.float32) * scale
        wih_b = jax.random.normal(keys[k + 3], (din, 4 * H), jnp.float32) * scale
        whh_b = jax.random.normal(keys[k + 4], (H, 4 * H), jnp.float32) * scale
        b_b = jax.random.normal(keys[k + 5], (1, 4 * H), jnp.float32) * scale
        raw_params.append((wih_f, whh_f, b_f, wih_b, whh_b, b_b))
        comb_params.append(
            combine_bilstm_params(wih_f, whh_f, b_f, wih_b, whh_b, b_b))
        k += 6

    out = cudnn_rnn_pallas(x, x_mask, comb_params, concat_layers=False)
    out = jax.block_until_ready(out)

    ref = cudnn_rnn_ref(x, x_mask, raw_params, concat_layers=False)
    assert out.shape == (B, L, 2 * H), out.shape
    assert jnp.allclose(out, ref, atol=1e-3, rtol=1e-3), "mismatch vs reference"

    print("KERNEL_OK")
</pallas_src>

<mosaic_0001>
module attributes {stable_mosaic.version = 11 : i64} {
  func.func @bilstm_layer_kernel(%arg0: memref<16x64xf32, #tpu.memory_space<vmem>>, %arg1: memref<64x256xf32, #tpu.memory_space<vmem>>, %arg2: memref<64x256xf32, #tpu.memory_space<vmem>>, %arg3: memref<1x256xf32, #tpu.memory_space<vmem>>, %arg4: memref<16x64xf32, #tpu.memory_space<vmem>>, %arg5: memref<16x256xf32, #tpu.memory_space<vmem>>) attributes {dimension_semantics = [], scalar_prefetch = 0 : i64, scratch_operands = 1 : i64, tpu.core_type = #tpu.core_type<tc>} {
    %c0 = arith.constant 0 : index
    %c0_0 = arith.constant 0 : index
    %0 = vector.load %arg0[%c0, %c0_0] : memref<16x64xf32, #tpu.memory_space<vmem>>, vector<16x64xf32>
    %c0_1 = arith.constant 0 : index
    %c0_2 = arith.constant 0 : index
    %1 = vector.load %arg1[%c0_1, %c0_2] : memref<64x256xf32, #tpu.memory_space<vmem>>, vector<64x256xf32>
    %cst = arith.constant dense<0.000000e+00> : vector<16x256xf32>
    %2 = tpu.matmul %0, %1, %cst {dimension_numbers = #tpu.dot_dimension_numbers<[1], [0], [0], [1], [0, 0, 1, 1], [], []>} : vector<16x64xf32>, vector<64x256xf32>, vector<16x256xf32> -> vector<16x256xf32>
    %c0_3 = arith.constant 0 : index
    %c0_4 = arith.constant 0 : index
    %3 = vector.load %arg3[%c0_3, %c0_4] : memref<1x256xf32, #tpu.memory_space<vmem>>, vector<1x256xf32>
    %4 = vector.broadcast %3 : vector<1x256xf32> to vector<16x256xf32>
    %5 = arith.addf %2, %4 : vector<16x256xf32>
    %c0_5 = arith.constant 0 : index
    %c0_6 = arith.constant 0 : index
    %6 = vector.load %arg5[%c0_5, %c0_6] : memref<16x256xf32, #tpu.memory_space<vmem>>, vector<16x256xf32>
    tpu.vector_store %arg5[%c0_5, %c0_6], %5 {strides = array<i32>} : memref<16x256xf32, #tpu.memory_space<vmem>>, vector<16x256xf32>,
    %c0_7 = arith.constant 0 : index
    %c0_8 = arith.constant 0 : index
    %7 = vector.load %arg2[%c0_7, %c0_8] : memref<64x256xf32, #tpu.memory_space<vmem>>, vector<64x256xf32>
    %cst_9 = arith.constant 0.000000e+00 : f32
    %8 = vector.broadcast %cst_9 : f32 to vector<2x64xf32>
    %cst_10 = arith.constant 0.000000e+00 : f32
    %9 = vector.broadcast %cst_10 : f32 to vector<2x64xf32>
    %c0_11 = arith.constant 0 : index
    %c0_12 = arith.constant 0 : index
    %10 = vector.load %arg5[%c0_11, %c0_12] : memref<16x256xf32, #tpu.memory_space<vmem>>, vector<2x256xf32>
    %cst_13 = arith.constant dense<0.000000e+00> : vector<2x256xf32>
    %11 = tpu.matmul %8, %7, %cst_13 {dimension_numbers = #tpu.dot_dimension_numbers<[1], [0], [0], [1], [0, 0, 1, 1], [], []>} : vector<2x64xf32>, vector<64x256xf32>, vector<2x256xf32> -> vector<2x256xf32>
    %12 = arith.addf %10, %11 : vector<2x256xf32>
    %13 = vector.extract_strided_slice %12 {offsets = [0, 0], sizes = [2, 64], strides = [1, 1]} : vector<2x256xf32> to vector<2x64xf32>
    %14 = arith.negf %13 : vector<2x64xf32>
    %15 = math.exp %14 : vector<2x64xf32>
    %cst_14 = arith.constant 1.000000e+00 : f32
    %16 = vector.broadcast %cst_14 : f32 to vector<2x64xf32>
    %17 = arith.addf %16, %15 : vector<2x64xf32>
    %18 = arith.divf %16, %17 : vector<2x64xf32>
    %19 = vector.extract_strided_slice %12 {offsets = [0, 64], sizes = [2, 64], strides = [1, 1]} : vector<2x256xf32> to vector<2x64xf32>
    %20 = arith.negf %19 : vector<2x64xf32>
    %21 = math.exp %20 : vector<2x64xf32>
    %cst_15 = arith.constant 1.000000e+00 : f32
    %22 = vector.broadcast %cst_15 : f32 to vector<2x64xf32>
    %23 = arith.addf %22, %21 : vector<2x64xf32>
    %24 = arith.divf %22, %23 : vector<2x64xf32>
    %25 = vector.extract_strided_slice %12 {offsets = [0, 128], sizes = [2, 64], strides = [1, 1]} : vector<2x256xf32> to vector<2x64xf32>
    %26 = math.tanh %25 : vector<2x64xf32>
    %27 = vector.extract_strided_slice %12 {offsets = [0, 192], sizes = [2, 64], strides = [1, 1]} : vector<2x256xf32> to vector<2x64xf32>
    %28 = arith.negf %27 : vector<2x64xf32>
    %29 = math.exp %28 : vector<2x64xf32>
    %cst_16 = arith.constant 1.000000e+00 : f32
    %30 = vector.broadcast %cst_16 : f32 to vector<2x64xf32>
    %31 = arith.addf %30, %29 : vector<2x64xf32>
    %32 = arith.divf %30, %31 : vector<2x64xf32>
    %33 = arith.mulf %24, %9 : vector<2x64xf32>
    %34 = arith.mulf %18, %26 : vector<2x64xf32>
    %35 = arith.addf %33, %34 : vector<2x64xf32>
    %36 = math.tanh %35 : vector<2x64xf32>
    %37 = arith.mulf %32, %36 : vector<2x64xf32>
    %c0_17 = arith.constant 0 : index
    %c0_18 = arith.constant 0 : index
    %38 = vector.load %arg4[%c0_17, %c0_18] : memref<16x64xf32, #tpu.memory_space<vmem>>, vector<2x64xf32>
    tpu.vector_store %arg4[%c0_17, %c0_18], %37 {strides = array<i32>} : memref<16x64xf32, #tpu.memory_space<vmem>>, vector<2x64xf32>,
    %c2 = arith.constant 2 : index
    %c0_19 = arith.constant 0 : index
    %39 = vector.load %arg5[%c2, %c0_19] : memref<16x256xf32, #tpu.memory_space<vmem>>, vector<2x256xf32>
    %cst_20 = arith.constant dense<0.000000e+00> : vector<2x256xf32>
    %40 = tpu.matmul %37, %7, %cst_20 {dimension_numbers = #tpu.dot_dimension_numbers<[1], [0], [0], [1], [0, 0, 1, 1], [], []>} : vector<2x64xf32>, vector<64x256xf32>, vector<2x256xf32> -> vector<2x256xf32>
    %41 = arith.addf %39, %40 : vector<2x256xf32>
    %42 = vector.extract_strided_slice %41 {offsets = [0, 0], sizes = [2, 64], strides = [1, 1]} : vector<2x256xf32> to vector<2x64xf32>
    %43 = arith.negf %42 : vector<2x64xf32>
    %44 = math.exp %43 : vector<2x64xf32>
    %cst_21 = arith.constant 1.000000e+00 : f32
    %45 = vector.broadcast %cst_21 : f32 to vector<2x64xf32>
    %46 = arith.addf %45, %44 : vector<2x64xf32>
    %47 = arith.divf %45, %46 : vector<2x64xf32>
    %48 = vector.extract_strided_slice %41 {offsets = [0, 64], sizes = [2, 64], strides = [1, 1]} : vector<2x256xf32> to vector<2x64xf32>
    %49 = arith.negf %48 : vector<2x64xf32>
    %50 = math.exp %49 : vector<2x64xf32>
    %cst_22 = arith.constant 1.000000e+00 : f32
    %51 = vector.broadcast %cst_22 : f32 to vector<2x64xf32>
    %52 = arith.addf %51, %50 : vector<2x64xf32>
    %53 = arith.divf %51, %52 : vector<2x64xf32>
    %54 = vector.extract_strided_slice %41 {offsets = [0, 128], sizes = [2, 64], strides = [1, 1]} : vector<2x256xf32> to vector<2x64xf32>
    %55 = math.tanh %54 : vector<2x64xf32>
    %56 = vector.extract_strided_slice %41 {offsets = [0, 192], sizes = [2, 64], strides = [1, 1]} : vector<2x256xf32> to vector<2x64xf32>
    %57 = arith.negf %56 : vector<2x64xf32>
    %58 = math.exp %57 : vector<2x64xf32>
    %cst_23 = arith.constant 1.000000e+00 : f32
    %59 = vector.broadcast %cst_23 : f32 to vector<2x64xf32>
    %60 = arith.addf %59, %58 : vector<2x64xf32>
    %61 = arith.divf %59, %60 : vector<2x64xf32>
    %62 = arith.mulf %53, %35 : vector<2x64xf32>
    %63 = arith.mulf %47, %55 : vector<2x64xf32>
    %64 = arith.addf %62, %63 : vector<2x64xf32>
    %65 = math.tanh %64 : vector<2x64xf32>
    %66 = arith.mulf %61, %65 : vector<2x64xf32>
    %c2_24 = arith.constant 2 : index
    %c0_25 = arith.constant 0 : index
    %67 = vector.load %arg4[%c2_24, %c0_25] : memref<16x64xf32, #tpu.memory_space<vmem>>, vector<2x64xf32>
    tpu.vector_store %arg4[%c2_24, %c0_25], %66 {strides = array<i32>} : memref<16x64xf32, #tpu.memory_space<vmem>>, vector<2x64xf32>,
    %c4 = arith.constant 4 : index
    %c0_26 = arith.constant 0 : index
    %68 = vector.load %arg5[%c4, %c0_26] : memref<16x256xf32, #tpu.memory_space<vmem>>, vector<2x256xf32>
    %cst_27 = arith.constant dense<0.000000e+00> : vector<2x256xf32>
    %69 = tpu.matmul %66, %7, %cst_27 {dimension_numbers = #tpu.dot_dimension_numbers<[1], [0], [0], [1], [0, 0, 1, 1], [], []>} : vector<2x64xf32>, vector<64x256xf32>, vector<2x256xf32> -> vector<2x256xf32>
    %70 = arith.addf %68, %69 : vector<2x256xf32>
    %71 = vector.extract_strided_slice %70 {offsets = [0, 0], sizes = [2, 64], strides = [1, 1]} : vector<2x256xf32> to vector<2x64xf32>
    %72 = arith.negf %71 : vector<2x64xf32>
    %73 = math.exp %72 : vector<2x64xf32>
    %cst_28 = arith.constant 1.000000e+00 : f32
    %74 = vector.broadcast %cst_28 : f32 to vector<2x64xf32>
    %75 = arith.addf %74, %73 : vector<2x64xf32>
    %76 = arith.divf %74, %75 : vector<2x64xf32>
    %77 = vector.extract_strided_slice %70 {offsets = [0, 64], sizes = [2, 64], strides = [1, 1]} : vector<2x256xf32> to vector<2x64xf32>
    %78 = arith.negf %77 : vector<2x64xf32>
    %79 = math.exp %78 : vector<2x64xf32>
    %cst_29 = arith.constant 1.000000e+00 : f32
    %80 = vector.broadcast %cst_29 : f32 to vector<2x64xf32>
    %81 = arith.addf %80, %79 : vector<2x64xf32>
    %82 = arith.divf %80, %81 : vector<2x64xf32>
    %83 = vector.extract_strided_slice %70 {offsets = [0, 128], sizes = [2, 64], strides = [1, 1]} : vector<2x256xf32> to vector<2x64xf32>
    %84 = math.tanh %83 : vector<2x64xf32>
    %85 = vector.extract_strided_slice %70 {offsets = [0, 192], sizes = [2, 64], strides = [1, 1]} : vector<2x256xf32> to vector<2x64xf32>
    %86 = arith.negf %85 : vector<2x64xf32>
    %87 = math.exp %86 : vector<2x64xf32>
    %cst_30 = arith.constant 1.000000e+00 : f32
    %88 = vector.broadcast %cst_30 : f32 to vector<2x64xf32>
    %89 = arith.addf %88, %87 : vector<2x64xf32>
    %90 = arith.divf %88, %89 : vector<2x64xf32>
    %91 = arith.mulf %82, %64 : vector<2x64xf32>
    %92 = arith.mulf %76, %84 : vector<2x64xf32>
    %93 = arith.addf %91, %92 : vector<2x64xf32>
    %94 = math.tanh %93 : vector<2x64xf32>
    %95 = arith.mulf %90, %94 : vector<2x64xf32>
    %c4_31 = arith.constant 4 : index
    %c0_32 = arith.constant 0 : index
    %96 = vector.load %arg4[%c4_31, %c0_32] : memref<16x64xf32, #tpu.memory_space<vmem>>, vector<2x64xf32>
    tpu.vector_store %arg4[%c4_31, %c0_32], %95 {strides = array<i32>} : memref<16x64xf32, #tpu.memory_space<vmem>>, vector<2x64xf32>,
    %c6 = arith.constant 6 : index
    %c0_33 = arith.constant 0 : index
    %97 = vector.load %arg5[%c6, %c0_33] : memref<16x256xf32, #tpu.memory_space<vmem>>, vector<2x256xf32>
    %cst_34 = arith.constant dense<0.000000e+00> : vector<2x256xf32>
    %98 = tpu.matmul %95, %7, %cst_34 {dimension_numbers = #tpu.dot_dimension_numbers<[1], [0], [0], [1], [0, 0, 1, 1], [], []>} : vector<2x64xf32>, vector<64x256xf32>, vector<2x256xf32> -> vector<2x256xf32>
    %99 = arith.addf %97, %98 : vector<2x256xf32>
    %100 = vector.extract_strided_slice %99 {offsets = [0, 0], sizes = [2, 64], strides = [1, 1]} : vector<2x256xf32> to vector<2x64xf32>
    %101 = arith.negf %100 : vector<2x64xf32>
    %102 = math.exp %101 : vector<2x64xf32>
    %cst_35 = arith.constant 1.000000e+00 : f32
    %103 = vector.broadcast %cst_35 : f32 to vector<2x64xf32>
    %104 = arith.addf %103, %102 : vector<2x64xf32>
    %105 = arith.divf %103, %104 : vector<2x64xf32>
    %106 = vector.extract_strided_slice %99 {offsets = [0, 64], sizes = [2, 64], strides = [1, 1]} : vector<2x256xf32> to vector<2x64xf32>
    %107 = arith.negf %106 : vector<2x64xf32>
    %108 = math.exp %107 : vector<2x64xf32>
    %cst_36 = arith.constant 1.000000e+00 : f32
    %109 = vector.broadcast %cst_36 : f32 to vector<2x64xf32>
    %110 = arith.addf %109, %108 : vector<2x64xf32>
    %111 = arith.divf %109, %110 : vector<2x64xf32>
    %112 = vector.extract_strided_slice %99 {offsets = [0, 128], sizes = [2, 64], strides = [1, 1]} : vector<2x256xf32> to vector<2x64xf32>
    %113 = math.tanh %112 : vector<2x64xf32>
    %114 = vector.extract_strided_slice %99 {offsets = [0, 192], sizes = [2, 64], strides = [1, 1]} : vector<2x256xf32> to vector<2x64xf32>
    %115 = arith.negf %114 : vector<2x64xf32>
    %116 = math.exp %115 : vector<2x64xf32>
    %cst_37 = arith.constant 1.000000e+00 : f32
    %117 = vector.broadcast %cst_37 : f32 to vector<2x64xf32>
    %118 = arith.addf %117, %116 : vector<2x64xf32>
    %119 = arith.divf %117, %118 : vector<2x64xf32>
    %120 = arith.mulf %111, %93 : vector<2x64xf32>
    %121 = arith.mulf %105, %113 : vector<2x64xf32>
    %122 = arith.addf %120, %121 : vector<2x64xf32>
    %123 = math.tanh %122 : vector<2x64xf32>
    %124 = arith.mulf %119, %123 : vector<2x64xf32>
    %c6_38 = arith.constant 6 : index
    %c0_39 = arith.constant 0 : index
    %125 = vector.load %arg4[%c6_38, %c0_39] : memref<16x64xf32, #tpu.memory_space<vmem>>, vector<2x64xf32>
    tpu.vector_store %arg4[%c6_38, %c0_39], %124 {strides = array<i32>} : memref<16x64xf32, #tpu.memory_space<vmem>>, vector<2x64xf32>,
    %c8 = arith.constant 8 : index
    %c0_40 = arith.constant 0 : index
    %126 = vector.load %arg5[%c8, %c0_40] : memref<16x256xf32, #tpu.memory_space<vmem>>, vector<2x256xf32>
    %cst_41 = arith.constant dense<0.000000e+00> : vector<2x256xf32>
    %127 = tpu.matmul %124, %7, %cst_41 {dimension_numbers = #tpu.dot_dimension_numbers<[1], [0], [0], [1], [0, 0, 1, 1], [], []>} : vector<2x64xf32>, vector<64x256xf32>, vector<2x256xf32> -> vector<2x256xf32>
    %128 = arith.addf %126, %127 : vector<2x256xf32>
    %129 = vector.extract_strided_slice %128 {offsets = [0, 0], sizes = [2, 64], strides = [1, 1]} : vector<2x256xf32> to vector<2x64xf32>
    %130 = arith.negf %129 : vector<2x64xf32>
    %131 = math.exp %130 : vector<2x64xf32>
    %cst_42 = arith.constant 1.000000e+00 : f32
    %132 = vector.broadcast %cst_42 : f32 to vector<2x64xf32>
    %133 = arith.addf %132, %131 : vector<2x64xf32>
    %134 = arith.divf %132, %133 : vector<2x64xf32>
    %135 = vector.extract_strided_slice %128 {offsets = [0, 64], sizes = [2, 64], strides = [1, 1]} : vector<2x256xf32> to vector<2x64xf32>
    %136 = arith.negf %135 : vector<2x64xf32>
    %137 = math.exp %136 : vector<2x64xf32>
    %cst_43 = arith.constant 1.000000e+00 : f32
    %138 = vector.broadcast %cst_43 : f32 to vector<2x64xf32>
    %139 = arith.addf %138, %137 : vector<2x64xf32>
    %140 = arith.divf %138, %139 : vector<2x64xf32>
    %141 = vector.extract_strided_slice %128 {offsets = [0, 128], sizes = [2, 64], strides = [1, 1]} : vector<2x256xf32> to vector<2x64xf32>
    %142 = math.tanh %141 : vector<2x64xf32>
    %143 = vector.extract_strided_slice %128 {offsets = [0, 192], sizes = [2, 64], strides = [1, 1]} : vector<2x256xf32> to vector<2x64xf32>
    %144 = arith.negf %143 : vector<2x64xf32>
    %145 = math.exp %144 : vector<2x64xf32>
    %cst_44 = arith.constant 1.000000e+00 : f32
    %146 = vector.broadcast %cst_44 : f32 to vector<2x64xf32>
    %147 = arith.addf %146, %145 : vector<2x64xf32>
    %148 = arith.divf %146, %147 : vector<2x64xf32>
    %149 = arith.mulf %140, %122 : vector<2x64xf32>
    %150 = arith.mulf %134, %142 : vector<2x64xf32>
    %151 = arith.addf %149, %150 : vector<2x64xf32>
    %152 = math.tanh %151 : vector<2x64xf32>
    %153 = arith.mulf %148, %152 : vector<2x64xf32>
    %c8_45 = arith.constant 8 : index
    %c0_46 = arith.constant 0 : index
    %154 = vector.load %arg4[%c8_45, %c0_46] : memref<16x64xf32, #tpu.memory_space<vmem>>, vector<2x64xf32>
    tpu.vector_store %arg4[%c8_45, %c0_46], %153 {strides = array<i32>} : memref<16x64xf32, #tpu.memory_space<vmem>>, vector<2x64xf32>,
    %c10 = arith.constant 10 : index
    %c0_47 = arith.constant 0 : index
    %155 = vector.load %arg5[%c10, %c0_47] : memref<16x256xf32, #tpu.memory_space<vmem>>, vector<2x256xf32>
    %cst_48 = arith.constant dense<0.000000e+00> : vector<2x256xf32>
    %156 = tpu.matmul %153, %7, %cst_48 {dimension_numbers = #tpu.dot_dimension_numbers<[1], [0], [0], [1], [0, 0, 1, 1], [], []>} : vector<2x64xf32>, vector<64x256xf32>, vector<2x256xf32> -> vector<2x256xf32>
    %157 = arith.addf %155, %156 : vector<2x256xf32>
    %158 = vector.extract_strided_slice %157 {offsets = [0, 0], sizes = [2, 64], strides = [1, 1]} : vector<2x256xf32> to vector<2x64xf32>
    %159 = arith.negf %158 : vector<2x64xf32>
    %160 = math.exp %159 : vector<2x64xf32>
    %cst_49 = arith.constant 1.000000e+00 : f32
    %161 = vector.broadcast %cst_49 : f32 to vector<2x64xf32>
    %162 = arith.addf %161, %160 : vector<2x64xf32>
    %163 = arith.divf %161, %162 : vector<2x64xf32>
    %164 = vector.extract_strided_slice %157 {offsets = [0, 64], sizes = [2, 64], strides = [1, 1]} : vector<2x256xf32> to vector<2x64xf32>
    %165 = arith.negf %164 : vector<2x64xf32>
    %166 = math.exp %165 : vector<2x64xf32>
    %cst_50 = arith.constant 1.000000e+00 : f32
    %167 = vector.broadcast %cst_50 : f32 to vector<2x64xf32>
    %168 = arith.addf %167, %166 : vector<2x64xf32>
    %169 = arith.divf %167, %168 : vector<2x64xf32>
    %170 = vector.extract_strided_slice %157 {offsets = [0, 128], sizes = [2, 64], strides = [1, 1]} : vector<2x256xf32> to vector<2x64xf32>
    %171 = math.tanh %170 : vector<2x64xf32>
    %172 = vector.extract_strided_slice %157 {offsets = [0, 192], sizes = [2, 64], strides = [1, 1]} : vector<2x256xf32> to vector<2x64xf32>
    %173 = arith.negf %172 : vector<2x64xf32>
    %174 = math.exp %173 : vector<2x64xf32>
    %cst_51 = arith.constant 1.000000e+00 : f32
    %175 = vector.broadcast %cst_51 : f32 to vector<2x64xf32>
    %176 = arith.addf %175, %174 : vector<2x64xf32>
    %177 = arith.divf %175, %176 : vector<2x64xf32>
    %178 = arith.mulf %169, %151 : vector<2x64xf32>
    %179 = arith.mulf %163, %171 : vector<2x64xf32>
    %180 = arith.addf %178, %179 : vector<2x64xf32>
    %181 = math.tanh %180 : vector<2x64xf32>
    %182 = arith.mulf %177, %181 : vector<2x64xf32>
    %c10_52 = arith.constant 10 : index
    %c0_53 = arith.constant 0 : index
    %183 = vector.load %arg4[%c10_52, %c0_53] : memref<16x64xf32, #tpu.memory_space<vmem>>, vector<2x64xf32>
    tpu.vector_store %arg4[%c10_52, %c0_53], %182 {strides = array<i32>} : memref<16x64xf32, #tpu.memory_space<vmem>>, vector<2x64xf32>,
    %c12 = arith.constant 12 : index
    %c0_54 = arith.constant 0 : index
    %184 = vector.load %arg5[%c12, %c0_54] : memref<16x256xf32, #tpu.memory_space<vmem>>, vector<2x256xf32>
    %cst_55 = arith.constant dense<0.000000e+00> : vector<2x256xf32>
    %185 = tpu.matmul %182, %7, %cst_55 {dimension_numbers = #tpu.dot_dimension_numbers<[1], [0], [0], [1], [0, 0, 1, 1], [], []>} : vector<2x64xf32>, vector<64x256xf32>, vector<2x256xf32> -> vector<2x256xf32>
    %186 = arith.addf %184, %185 : vector<2x256xf32>
    %187 = vector.extract_strided_slice %186 {offsets = [0, 0], sizes = [2, 64], strides = [1, 1]} : vector<2x256xf32> to vector<2x64xf32>
    %188 = arith.negf %187 : vector<2x64xf32>
    %189 = math.exp %188 : vector<2x64xf32>
    %cst_56 = arith.constant 1.000000e+00 : f32
    %190 = vector.broadcast %cst_56 : f32 to vector<2x64xf32>
    %191 = arith.addf %190, %189 : vector<2x64xf32>
    %192 = arith.divf %190, %191 : vector<2x64xf32>
    %193 = vector.extract_strided_slice %186 {offsets = [0, 64], sizes = [2, 64], strides = [1, 1]} : vector<2x256xf32> to vector<2x64xf32>
    %194 = arith.negf %193 : vector<2x64xf32>
    %195 = math.exp %194 : vector<2x64xf32>
    %cst_57 = arith.constant 1.000000e+00 : f32
    %196 = vector.broadcast %cst_57 : f32 to vector<2x64xf32>
    %197 = arith.addf %196, %195 : vector<2x64xf32>
    %198 = arith.divf %196, %197 : vector<2x64xf32>
    %199 = vector.extract_strided_slice %186 {offsets = [0, 128], sizes = [2, 64], strides = [1, 1]} : vector<2x256xf32> to vector<2x64xf32>
    %200 = math.tanh %199 : vector<2x64xf32>
    %201 = vector.extract_strided_slice %186 {offsets = [0, 192], sizes = [2, 64], strides = [1, 1]} : vector<2x256xf32> to vector<2x64xf32>
    %202 = arith.negf %201 : vector<2x64xf32>
    %203 = math.exp %202 : vector<2x64xf32>
    %cst_58 = arith.constant 1.000000e+00 : f32
    %204 = vector.broadcast %cst_58 : f32 to vector<2x64xf32>
    %205 = arith.addf %204, %203 : vector<2x64xf32>
    %206 = arith.divf %204, %205 : vector<2x64xf32>
    %207 = arith.mulf %198, %180 : vector<2x64xf32>
    %208 = arith.mulf %192, %200 : vector<2x64xf32>
    %209 = arith.addf %207, %208 : vector<2x64xf32>
    %210 = math.tanh %209 : vector<2x64xf32>
    %211 = arith.mulf %206, %210 : vector<2x64xf32>
    %c12_59 = arith.constant 12 : index
    %c0_60 = arith.constant 0 : index
    %212 = vector.load %arg4[%c12_59, %c0_60] : memref<16x64xf32, #tpu.memory_space<vmem>>, vector<2x64xf32>
    tpu.vector_store %arg4[%c12_59, %c0_60], %211 {strides = array<i32>} : memref<16x64xf32, #tpu.memory_space<vmem>>, vector<2x64xf32>,
    %c14 = arith.constant 14 : index
    %c0_61 = arith.constant 0 : index
    %213 = vector.load %arg5[%c14, %c0_61] : memref<16x256xf32, #tpu.memory_space<vmem>>, vector<2x256xf32>
    %cst_62 = arith.constant dense<0.000000e+00> : vector<2x256xf32>
    %214 = tpu.matmul %211, %7, %cst_62 {dimension_numbers = #tpu.dot_dimension_numbers<[1], [0], [0], [1], [0, 0, 1, 1], [], []>} : vector<2x64xf32>, vector<64x256xf32>, vector<2x256xf32> -> vector<2x256xf32>
    %215 = arith.addf %213, %214 : vector<2x256xf32>
    %216 = vector.extract_strided_slice %215 {offsets = [0, 0], sizes = [2, 64], strides = [1, 1]} : vector<2x256xf32> to vector<2x64xf32>
    %217 = arith.negf %216 : vector<2x64xf32>
    %218 = math.exp %217 : vector<2x64xf32>
    %cst_63 = arith.constant 1.000000e+00 : f32
    %219 = vector.broadcast %cst_63 : f32 to vector<2x64xf32>
    %220 = arith.addf %219, %218 : vector<2x64xf32>
    %221 = arith.divf %219, %220 : vector<2x64xf32>
    %222 = vector.extract_strided_slice %215 {offsets = [0, 64], sizes = [2, 64], strides = [1, 1]} : vector<2x256xf32> to vector<2x64xf32>
    %223 = arith.negf %222 : vector<2x64xf32>
    %224 = math.exp %223 : vector<2x64xf32>
    %cst_64 = arith.constant 1.000000e+00 : f32
    %225 = vector.broadcast %cst_64 : f32 to vector<2x64xf32>
    %226 = arith.addf %225, %224 : vector<2x64xf32>
    %227 = arith.divf %225, %226 : vector<2x64xf32>
    %228 = vector.extract_strided_slice %215 {offsets = [0, 128], sizes = [2, 64], strides = [1, 1]} : vector<2x256xf32> to vector<2x64xf32>
    %229 = math.tanh %228 : vector<2x64xf32>
    %230 = vector.extract_strided_slice %215 {offsets = [0, 192], sizes = [2, 64], strides = [1, 1]} : vector<2x256xf32> to vector<2x64xf32>
    %231 = arith.negf %230 : vector<2x64xf32>
    %232 = math.exp %231 : vector<2x64xf32>
    %cst_65 = arith.constant 1.000000e+00 : f32
    %233 = vector.broadcast %cst_65 : f32 to vector<2x64xf32>
    %234 = arith.addf %233, %232 : vector<2x64xf32>
    %235 = arith.divf %233, %234 : vector<2x64xf32>
    %236 = arith.mulf %227, %209 : vector<2x64xf32>
    %237 = arith.mulf %221, %229 : vector<2x64xf32>
    %238 = arith.addf %236, %237 : vector<2x64xf32>
    %239 = math.tanh %238 : vector<2x64xf32>
    %240 = arith.mulf %235, %239 : vector<2x64xf32>
    %c14_66 = arith.constant 14 : index
    %c0_67 = arith.constant 0 : index
    %241 = vector.load %arg4[%c14_66, %c0_67] : memref<16x64xf32, #tpu.memory_space<vmem>>, vector<2x64xf32>
    tpu.vector_store %arg4[%c14_66, %c0_67], %240 {strides = array<i32>} : memref<16x64xf32, #tpu.memory_space<vmem>>, vector<2x64xf32>,
    return
  }
}

module attributes {stable_mosaic.version = 11 : i64} {
  func.func @bilstm_layer_kernel(%arg0: memref<16x128xf32, #tpu.memory_space<vmem>>, %arg1: memref<128x256xf32, #tpu.memory_space<vmem>>, %arg2: memref<64x256xf32, #tpu.memory_space<vmem>>, %arg3: memref<1x256xf32, #tpu.memory_space<vmem>>, %arg4: memref<16x64xf32, #tpu.memory_space<vmem>>, %arg5: memref<16x256xf32, #tpu.memory_space<vmem>>) attributes {dimension_semantics = [], scalar_prefetch = 0 : i64, scratch_operands = 1 : i64, tpu.core_type = #tpu.core_type<tc>} {
    %c0 = arith.constant 0 : index
    %c0_0 = arith.constant 0 : index
    %0 = vector.load %arg0[%c0, %c0_0] : memref<16x128xf32, #tpu.memory_space<vmem>>, vector<16x128xf32>
    %c0_1 = arith.constant 0 : index
    %c0_2 = arith.constant 0 : index
    %1 = vector.load %arg1[%c0_1, %c0_2] : memref<128x256xf32, #tpu.memory_space<vmem>>, vector<128x256xf32>
    %cst = arith.constant dense<0.000000e+00> : vector<16x256xf32>
    %2 = tpu.matmul %0, %1, %cst {dimension_numbers = #tpu.dot_dimension_numbers<[1], [0], [0], [1], [0, 0, 1, 1], [], []>} : vector<16x128xf32>, vector<128x256xf32>, vector<16x256xf32> -> vector<16x256xf32>
    %c0_3 = arith.constant 0 : index
    %c0_4 = arith.constant 0 : index
    %3 = vector.load %arg3[%c0_3, %c0_4] : memref<1x256xf32, #tpu.memory_space<vmem>>, vector<1x256xf32>
    %4 = vector.broadcast %3 : vector<1x256xf32> to vector<16x256xf32>
    %5 = arith.addf %2, %4 : vector<16x256xf32>
    %c0_5 = arith.constant 0 : index
    %c0_6 = arith.constant 0 : index
    %6 = vector.load %arg5[%c0_5, %c0_6] : memref<16x256xf32, #tpu.memory_space<vmem>>, vector<16x256xf32>
    tpu.vector_store %arg5[%c0_5, %c0_6], %5 {strides = array<i32>} : memref<16x256xf32, #tpu.memory_space<vmem>>, vector<16x256xf32>,
    %c0_7 = arith.constant 0 : index
    %c0_8 = arith.constant 0 : index
    %7 = vector.load %arg2[%c0_7, %c0_8] : memref<64x256xf32, #tpu.memory_space<vmem>>, vector<64x256xf32>
    %cst_9 = arith.constant 0.000000e+00 : f32
    %8 = vector.broadcast %cst_9 : f32 to vector<2x64xf32>
    %cst_10 = arith.constant 0.000000e+00 : f32
    %9 = vector.broadcast %cst_10 : f32 to vector<2x64xf32>
    %c0_11 = arith.constant 0 : index
    %c0_12 = arith.constant 0 : index
    %10 = vector.load %arg5[%c0_11, %c0_12] : memref<16x256xf32, #tpu.memory_space<vmem>>, vector<2x256xf32>
    %cst_13 = arith.constant dense<0.000000e+00> : vector<2x256xf32>
    %11 = tpu.matmul %8, %7, %cst_13 {dimension_numbers = #tpu.dot_dimension_numbers<[1], [0], [0], [1], [0, 0, 1, 1], [], []>} : vector<2x64xf32>, vector<64x256xf32>, vector<2x256xf32> -> vector<2x256xf32>
    %12 = arith.addf %10, %11 : vector<2x256xf32>
    %13 = vector.extract_strided_slice %12 {offsets = [0, 0], sizes = [2, 64], strides = [1, 1]} : vector<2x256xf32> to vector<2x64xf32>
    %14 = arith.negf %13 : vector<2x64xf32>
    %15 = math.exp %14 : vector<2x64xf32>
    %cst_14 = arith.constant 1.000000e+00 : f32
    %16 = vector.broadcast %cst_14 : f32 to vector<2x64xf32>
    %17 = arith.addf %16, %15 : vector<2x64xf32>
    %18 = arith.divf %16, %17 : vector<2x64xf32>
    %19 = vector.extract_strided_slice %12 {offsets = [0, 64], sizes = [2, 64], strides = [1, 1]} : vector<2x256xf32> to vector<2x64xf32>
    %20 = arith.negf %19 : vector<2x64xf32>
    %21 = math.exp %20 : vector<2x64xf32>
    %cst_15 = arith.constant 1.000000e+00 : f32
    %22 = vector.broadcast %cst_15 : f32 to vector<2x64xf32>
    %23 = arith.addf %22, %21 : vector<2x64xf32>
    %24 = arith.divf %22, %23 : vector<2x64xf32>
    %25 = vector.extract_strided_slice %12 {offsets = [0, 128], sizes = [2, 64], strides = [1, 1]} : vector<2x256xf32> to vector<2x64xf32>
    %26 = math.tanh %25 : vector<2x64xf32>
    %27 = vector.extract_strided_slice %12 {offsets = [0, 192], sizes = [2, 64], strides = [1, 1]} : vector<2x256xf32> to vector<2x64xf32>
    %28 = arith.negf %27 : vector<2x64xf32>
    %29 = math.exp %28 : vector<2x64xf32>
    %cst_16 = arith.constant 1.000000e+00 : f32
    %30 = vector.broadcast %cst_16 : f32 to vector<2x64xf32>
    %31 = arith.addf %30, %29 : vector<2x64xf32>
    %32 = arith.divf %30, %31 : vector<2x64xf32>
    %33 = arith.mulf %24, %9 : vector<2x64xf32>
    %34 = arith.mulf %18, %26 : vector<2x64xf32>
    %35 = arith.addf %33, %34 : vector<2x64xf32>
    %36 = math.tanh %35 : vector<2x64xf32>
    %37 = arith.mulf %32, %36 : vector<2x64xf32>
    %c0_17 = arith.constant 0 : index
    %c0_18 = arith.constant 0 : index
    %38 = vector.load %arg4[%c0_17, %c0_18] : memref<16x64xf32, #tpu.memory_space<vmem>>, vector<2x64xf32>
    tpu.vector_store %arg4[%c0_17, %c0_18], %37 {strides = array<i32>} : memref<16x64xf32, #tpu.memory_space<vmem>>, vector<2x64xf32>,
    %c2 = arith.constant 2 : index
    %c0_19 = arith.constant 0 : index
    %39 = vector.load %arg5[%c2, %c0_19] : memref<16x256xf32, #tpu.memory_space<vmem>>, vector<2x256xf32>
    %cst_20 = arith.constant dense<0.000000e+00> : vector<2x256xf32>
    %40 = tpu.matmul %37, %7, %cst_20 {dimension_numbers = #tpu.dot_dimension_numbers<[1], [0], [0], [1], [0, 0, 1, 1], [], []>} : vector<2x64xf32>, vector<64x256xf32>, vector<2x256xf32> -> vector<2x256xf32>
    %41 = arith.addf %39, %40 : vector<2x256xf32>
    %42 = vector.extract_strided_slice %41 {offsets = [0, 0], sizes = [2, 64], strides = [1, 1]} : vector<2x256xf32> to vector<2x64xf32>
    %43 = arith.negf %42 : vector<2x64xf32>
    %44 = math.exp %43 : vector<2x64xf32>
    %cst_21 = arith.constant 1.000000e+00 : f32
    %45 = vector.broadcast %cst_21 : f32 to vector<2x64xf32>
    %46 = arith.addf %45, %44 : vector<2x64xf32>
    %47 = arith.divf %45, %46 : vector<2x64xf32>
    %48 = vector.extract_strided_slice %41 {offsets = [0, 64], sizes = [2, 64], strides = [1, 1]} : vector<2x256xf32> to vector<2x64xf32>
    %49 = arith.negf %48 : vector<2x64xf32>
    %50 = math.exp %49 : vector<2x64xf32>
    %cst_22 = arith.constant 1.000000e+00 : f32
    %51 = vector.broadcast %cst_22 : f32 to vector<2x64xf32>
    %52 = arith.addf %51, %50 : vector<2x64xf32>
    %53 = arith.divf %51, %52 : vector<2x64xf32>
    %54 = vector.extract_strided_slice %41 {offsets = [0, 128], sizes = [2, 64], strides = [1, 1]} : vector<2x256xf32> to vector<2x64xf32>
    %55 = math.tanh %54 : vector<2x64xf32>
    %56 = vector.extract_strided_slice %41 {offsets = [0, 192], sizes = [2, 64], strides = [1, 1]} : vector<2x256xf32> to vector<2x64xf32>
    %57 = arith.negf %56 : vector<2x64xf32>
    %58 = math.exp %57 : vector<2x64xf32>
    %cst_23 = arith.constant 1.000000e+00 : f32
    %59 = vector.broadcast %cst_23 : f32 to vector<2x64xf32>
    %60 = arith.addf %59, %58 : vector<2x64xf32>
    %61 = arith.divf %59, %60 : vector<2x64xf32>
    %62 = arith.mulf %53, %35 : vector<2x64xf32>
    %63 = arith.mulf %47, %55 : vector<2x64xf32>
    %64 = arith.addf %62, %63 : vector<2x64xf32>
    %65 = math.tanh %64 : vector<2x64xf32>
    %66 = arith.mulf %61, %65 : vector<2x64xf32>
    %c2_24 = arith.constant 2 : index
    %c0_25 = arith.constant 0 : index
    %67 = vector.load %arg4[%c2_24, %c0_25] : memref<16x64xf32, #tpu.memory_space<vmem>>, vector<2x64xf32>
    tpu.vector_store %arg4[%c2_24, %c0_25], %66 {strides = array<i32>} : memref<16x64xf32, #tpu.memory_space<vmem>>, vector<2x64xf32>,
    %c4 = arith.constant 4 : index
    %c0_26 = arith.constant 0 : index
    %68 = vector.load %arg5[%c4, %c0_26] : memref<16x256xf32, #tpu.memory_space<vmem>>, vector<2x256xf32>
    %cst_27 = arith.constant dense<0.000000e+00> : vector<2x256xf32>
    %69 = tpu.matmul %66, %7, %cst_27 {dimension_numbers = #tpu.dot_dimension_numbers<[1], [0], [0], [1], [0, 0, 1, 1], [], []>} : vector<2x64xf32>, vector<64x256xf32>, vector<2x256xf32> -> vector<2x256xf32>
    %70 = arith.addf %68, %69 : vector<2x256xf32>
    %71 = vector.extract_strided_slice %70 {offsets = [0, 0], sizes = [2, 64], strides = [1, 1]} : vector<2x256xf32> to vector<2x64xf32>
    %72 = arith.negf %71 : vector<2x64xf32>
    %73 = math.exp %72 : vector<2x64xf32>
    %cst_28 = arith.constant 1.000000e+00 : f32
    %74 = vector.broadcast %cst_28 : f32 to vector<2x64xf32>
    %75 = arith.addf %74, %73 : vector<2x64xf32>
    %76 = arith.divf %74, %75 : vector<2x64xf32>
    %77 = vector.extract_strided_slice %70 {offsets = [0, 64], sizes = [2, 64], strides = [1, 1]} : vector<2x256xf32> to vector<2x64xf32>
    %78 = arith.negf %77 : vector<2x64xf32>
    %79 = math.exp %78 : vector<2x64xf32>
    %cst_29 = arith.constant 1.000000e+00 : f32
    %80 = vector.broadcast %cst_29 : f32 to vector<2x64xf32>
    %81 = arith.addf %80, %79 : vector<2x64xf32>
    %82 = arith.divf %80, %81 : vector<2x64xf32>
    %83 = vector.extract_strided_slice %70 {offsets = [0, 128], sizes = [2, 64], strides = [1, 1]} : vector<2x256xf32> to vector<2x64xf32>
    %84 = math.tanh %83 : vector<2x64xf32>
    %85 = vector.extract_strided_slice %70 {offsets = [0, 192], sizes = [2, 64], strides = [1, 1]} : vector<2x256xf32> to vector<2x64xf32>
    %86 = arith.negf %85 : vector<2x64xf32>
    %87 = math.exp %86 : vector<2x64xf32>
    %cst_30 = arith.constant 1.000000e+00 : f32
    %88 = vector.broadcast %cst_30 : f32 to vector<2x64xf32>
    %89 = arith.addf %88, %87 : vector<2x64xf32>
    %90 = arith.divf %88, %89 : vector<2x64xf32>
    %91 = arith.mulf %82, %64 : vector<2x64xf32>
    %92 = arith.mulf %76, %84 : vector<2x64xf32>
    %93 = arith.addf %91, %92 : vector<2x64xf32>
    %94 = math.tanh %93 : vector<2x64xf32>
    %95 = arith.mulf %90, %94 : vector<2x64xf32>
    %c4_31 = arith.constant 4 : index
    %c0_32 = arith.constant 0 : index
    %96 = vector.load %arg4[%c4_31, %c0_32] : memref<16x64xf32, #tpu.memory_space<vmem>>, vector<2x64xf32>
    tpu.vector_store %arg4[%c4_31, %c0_32], %95 {strides = array<i32>} : memref<16x64xf32, #tpu.memory_space<vmem>>, vector<2x64xf32>,
    %c6 = arith.constant 6 : index
    %c0_33 = arith.constant 0 : index
    %97 = vector.load %arg5[%c6, %c0_33] : memref<16x256xf32, #tpu.memory_space<vmem>>, vector<2x256xf32>
    %cst_34 = arith.constant dense<0.000000e+00> : vector<2x256xf32>
    %98 = tpu.matmul %95, %7, %cst_34 {dimension_numbers = #tpu.dot_dimension_numbers<[1], [0], [0], [1], [0, 0, 1, 1], [], []>} : vector<2x64xf32>, vector<64x256xf32>, vector<2x256xf32> -> vector<2x256xf32>
    %99 = arith.addf %97, %98 : vector<2x256xf32>
    %100 = vector.extract_strided_slice %99 {offsets = [0, 0], sizes = [2, 64], strides = [1, 1]} : vector<2x256xf32> to vector<2x64xf32>
    %101 = arith.negf %100 : vector<2x64xf32>
    %102 = math.exp %101 : vector<2x64xf32>
    %cst_35 = arith.constant 1.000000e+00 : f32
    %103 = vector.broadcast %cst_35 : f32 to vector<2x64xf32>
    %104 = arith.addf %103, %102 : vector<2x64xf32>
    %105 = arith.divf %103, %104 : vector<2x64xf32>
    %106 = vector.extract_strided_slice %99 {offsets = [0, 64], sizes = [2, 64], strides = [1, 1]} : vector<2x256xf32> to vector<2x64xf32>
    %107 = arith.negf %106 : vector<2x64xf32>
    %108 = math.exp %107 : vector<2x64xf32>
    %cst_36 = arith.constant 1.000000e+00 : f32
    %109 = vector.broadcast %cst_36 : f32 to vector<2x64xf32>
    %110 = arith.addf %109, %108 : vector<2x64xf32>
    %111 = arith.divf %109, %110 : vector<2x64xf32>
    %112 = vector.extract_strided_slice %99 {offsets = [0, 128], sizes = [2, 64], strides = [1, 1]} : vector<2x256xf32> to vector<2x64xf32>
    %113 = math.tanh %112 : vector<2x64xf32>
    %114 = vector.extract_strided_slice %99 {offsets = [0, 192], sizes = [2, 64], strides = [1, 1]} : vector<2x256xf32> to vector<2x64xf32>
    %115 = arith.negf %114 : vector<2x64xf32>
    %116 = math.exp %115 : vector<2x64xf32>
    %cst_37 = arith.constant 1.000000e+00 : f32
    %117 = vector.broadcast %cst_37 : f32 to vector<2x64xf32>
    %118 = arith.addf %117, %116 : vector<2x64xf32>
    %119 = arith.divf %117, %118 : vector<2x64xf32>
    %120 = arith.mulf %111, %93 : vector<2x64xf32>
    %121 = arith.mulf %105, %113 : vector<2x64xf32>
    %122 = arith.addf %120, %121 : vector<2x64xf32>
    %123 = math.tanh %122 : vector<2x64xf32>
    %124 = arith.mulf %119, %123 : vector<2x64xf32>
    %c6_38 = arith.constant 6 : index
    %c0_39 = arith.constant 0 : index
    %125 = vector.load %arg4[%c6_38, %c0_39] : memref<16x64xf32, #tpu.memory_space<vmem>>, vector<2x64xf32>
    tpu.vector_store %arg4[%c6_38, %c0_39], %124 {strides = array<i32>} : memref<16x64xf32, #tpu.memory_space<vmem>>, vector<2x64xf32>,
    %c8 = arith.constant 8 : index
    %c0_40 = arith.constant 0 : index
    %126 = vector.load %arg5[%c8, %c0_40] : memref<16x256xf32, #tpu.memory_space<vmem>>, vector<2x256xf32>
    %cst_41 = arith.constant dense<0.000000e+00> : vector<2x256xf32>
    %127 = tpu.matmul %124, %7, %cst_41 {dimension_numbers = #tpu.dot_dimension_numbers<[1], [0], [0], [1], [0, 0, 1, 1], [], []>} : vector<2x64xf32>, vector<64x256xf32>, vector<2x256xf32> -> vector<2x256xf32>
    %128 = arith.addf %126, %127 : vector<2x256xf32>
    %129 = vector.extract_strided_slice %128 {offsets = [0, 0], sizes = [2, 64], strides = [1, 1]} : vector<2x256xf32> to vector<2x64xf32>
    %130 = arith.negf %129 : vector<2x64xf32>
    %131 = math.exp %130 : vector<2x64xf32>
    %cst_42 = arith.constant 1.000000e+00 : f32
    %132 = vector.broadcast %cst_42 : f32 to vector<2x64xf32>
    %133 = arith.addf %132, %131 : vector<2x64xf32>
    %134 = arith.divf %132, %133 : vector<2x64xf32>
    %135 = vector.extract_strided_slice %128 {offsets = [0, 64], sizes = [2, 64], strides = [1, 1]} : vector<2x256xf32> to vector<2x64xf32>
    %136 = arith.negf %135 : vector<2x64xf32>
    %137 = math.exp %136 : vector<2x64xf32>
    %cst_43 = arith.constant 1.000000e+00 : f32
    %138 = vector.broadcast %cst_43 : f32 to vector<2x64xf32>
    %139 = arith.addf %138, %137 : vector<2x64xf32>
    %140 = arith.divf %138, %139 : vector<2x64xf32>
    %141 = vector.extract_strided_slice %128 {offsets = [0, 128], sizes = [2, 64], strides = [1, 1]} : vector<2x256xf32> to vector<2x64xf32>
    %142 = math.tanh %141 : vector<2x64xf32>
    %143 = vector.extract_strided_slice %128 {offsets = [0, 192], sizes = [2, 64], strides = [1, 1]} : vector<2x256xf32> to vector<2x64xf32>
    %144 = arith.negf %143 : vector<2x64xf32>
    %145 = math.exp %144 : vector<2x64xf32>
    %cst_44 = arith.constant 1.000000e+00 : f32
    %146 = vector.broadcast %cst_44 : f32 to vector<2x64xf32>
    %147 = arith.addf %146, %145 : vector<2x64xf32>
    %148 = arith.divf %146, %147 : vector<2x64xf32>
    %149 = arith.mulf %140, %122 : vector<2x64xf32>
    %150 = arith.mulf %134, %142 : vector<2x64xf32>
    %151 = arith.addf %149, %150 : vector<2x64xf32>
    %152 = math.tanh %151 : vector<2x64xf32>
    %153 = arith.mulf %148, %152 : vector<2x64xf32>
    %c8_45 = arith.constant 8 : index
    %c0_46 = arith.constant 0 : index
    %154 = vector.load %arg4[%c8_45, %c0_46] : memref<16x64xf32, #tpu.memory_space<vmem>>, vector<2x64xf32>
    tpu.vector_store %arg4[%c8_45, %c0_46], %153 {strides = array<i32>} : memref<16x64xf32, #tpu.memory_space<vmem>>, vector<2x64xf32>,
    %c10 = arith.constant 10 : index
    %c0_47 = arith.constant 0 : index
    %155 = vector.load %arg5[%c10, %c0_47] : memref<16x256xf32, #tpu.memory_space<vmem>>, vector<2x256xf32>
    %cst_48 = arith.constant dense<0.000000e+00> : vector<2x256xf32>
    %156 = tpu.matmul %153, %7, %cst_48 {dimension_numbers = #tpu.dot_dimension_numbers<[1], [0], [0], [1], [0, 0, 1, 1], [], []>} : vector<2x64xf32>, vector<64x256xf32>, vector<2x256xf32> -> vector<2x256xf32>
    %157 = arith.addf %155, %156 : vector<2x256xf32>
    %158 = vector.extract_strided_slice %157 {offsets = [0, 0], sizes = [2, 64], strides = [1, 1]} : vector<2x256xf32> to vector<2x64xf32>
    %159 = arith.negf %158 : vector<2x64xf32>
    %160 = math.exp %159 : vector<2x64xf32>
    %cst_49 = arith.constant 1.000000e+00 : f32
    %161 = vector.broadcast %cst_49 : f32 to vector<2x64xf32>
    %162 = arith.addf %161, %160 : vector<2x64xf32>
    %163 = arith.divf %161, %162 : vector<2x64xf32>
    %164 = vector.extract_strided_slice %157 {offsets = [0, 64], sizes = [2, 64], strides = [1, 1]} : vector<2x256xf32> to vector<2x64xf32>
    %165 = arith.negf %164 : vector<2x64xf32>
    %166 = math.exp %165 : vector<2x64xf32>
    %cst_50 = arith.constant 1.000000e+00 : f32
    %167 = vector.broadcast %cst_50 : f32 to vector<2x64xf32>
    %168 = arith.addf %167, %166 : vector<2x64xf32>
    %169 = arith.divf %167, %168 : vector<2x64xf32>
    %170 = vector.extract_strided_slice %157 {offsets = [0, 128], sizes = [2, 64], strides = [1, 1]} : vector<2x256xf32> to vector<2x64xf32>
    %171 = math.tanh %170 : vector<2x64xf32>
    %172 = vector.extract_strided_slice %157 {offsets = [0, 192], sizes = [2, 64], strides = [1, 1]} : vector<2x256xf32> to vector<2x64xf32>
    %173 = arith.negf %172 : vector<2x64xf32>
    %174 = math.exp %173 : vector<2x64xf32>
    %cst_51 = arith.constant 1.000000e+00 : f32
    %175 = vector.broadcast %cst_51 : f32 to vector<2x64xf32>
    %176 = arith.addf %175, %174 : vector<2x64xf32>
    %177 = arith.divf %175, %176 : vector<2x64xf32>
    %178 = arith.mulf %169, %151 : vector<2x64xf32>
    %179 = arith.mulf %163, %171 : vector<2x64xf32>
    %180 = arith.addf %178, %179 : vector<2x64xf32>
    %181 = math.tanh %180 : vector<2x64xf32>
    %182 = arith.mulf %177, %181 : vector<2x64xf32>
    %c10_52 = arith.constant 10 : index
    %c0_53 = arith.constant 0 : index
    %183 = vector.load %arg4[%c10_52, %c0_53] : memref<16x64xf32, #tpu.memory_space<vmem>>, vector<2x64xf32>
    tpu.vector_store %arg4[%c10_52, %c0_53], %182 {strides = array<i32>} : memref<16x64xf32, #tpu.memory_space<vmem>>, vector<2x64xf32>,
    %c12 = arith.constant 12 : index
    %c0_54 = arith.constant 0 : index
    %184 = vector.load %arg5[%c12, %c0_54] : memref<16x256xf32, #tpu.memory_space<vmem>>, vector<2x256xf32>
    %cst_55 = arith.constant dense<0.000000e+00> : vector<2x256xf32>
    %185 = tpu.matmul %182, %7, %cst_55 {dimension_numbers = #tpu.dot_dimension_numbers<[1], [0], [0], [1], [0, 0, 1, 1], [], []>} : vector<2x64xf32>, vector<64x256xf32>, vector<2x256xf32> -> vector<2x256xf32>
    %186 = arith.addf %184, %185 : vector<2x256xf32>
    %187 = vector.extract_strided_slice %186 {offsets = [0, 0], sizes = [2, 64], strides = [1, 1]} : vector<2x256xf32> to vector<2x64xf32>
    %188 = arith.negf %187 : vector<2x64xf32>
    %189 = math.exp %188 : vector<2x64xf32>
    %cst_56 = arith.constant 1.000000e+00 : f32
    %190 = vector.broadcast %cst_56 : f32 to vector<2x64xf32>
    %191 = arith.addf %190, %189 : vector<2x64xf32>
    %192 = arith.divf %190, %191 : vector<2x64xf32>
    %193 = vector.extract_strided_slice %186 {offsets = [0, 64], sizes = [2, 64], strides = [1, 1]} : vector<2x256xf32> to vector<2x64xf32>
    %194 = arith.negf %193 : vector<2x64xf32>
    %195 = math.exp %194 : vector<2x64xf32>
    %cst_57 = arith.constant 1.000000e+00 : f32
    %196 = vector.broadcast %cst_57 : f32 to vector<2x64xf32>
    %197 = arith.addf %196, %195 : vector<2x64xf32>
    %198 = arith.divf %196, %197 : vector<2x64xf32>
    %199 = vector.extract_strided_slice %186 {offsets = [0, 128], sizes = [2, 64], strides = [1, 1]} : vector<2x256xf32> to vector<2x64xf32>
    %200 = math.tanh %199 : vector<2x64xf32>
    %201 = vector.extract_strided_slice %186 {offsets = [0, 192], sizes = [2, 64], strides = [1, 1]} : vector<2x256xf32> to vector<2x64xf32>
    %202 = arith.negf %201 : vector<2x64xf32>
    %203 = math.exp %202 : vector<2x64xf32>
    %cst_58 = arith.constant 1.000000e+00 : f32
    %204 = vector.broadcast %cst_58 : f32 to vector<2x64xf32>
    %205 = arith.addf %204, %203 : vector<2x64xf32>
    %206 = arith.divf %204, %205 : vector<2x64xf32>
    %207 = arith.mulf %198, %180 : vector<2x64xf32>
    %208 = arith.mulf %192, %200 : vector<2x64xf32>
    %209 = arith.addf %207, %208 : vector<2x64xf32>
    %210 = math.tanh %209 : vector<2x64xf32>
    %211 = arith.mulf %206, %210 : vector<2x64xf32>
    %c12_59 = arith.constant 12 : index
    %c0_60 = arith.constant 0 : index
    %212 = vector.load %arg4[%c12_59, %c0_60] : memref<16x64xf32, #tpu.memory_space<vmem>>, vector<2x64xf32>
    tpu.vector_store %arg4[%c12_59, %c0_60], %211 {strides = array<i32>} : memref<16x64xf32, #tpu.memory_space<vmem>>, vector<2x64xf32>,
    %c14 = arith.constant 14 : index
    %c0_61 = arith.constant 0 : index
    %213 = vector.load %arg5[%c14, %c0_61] : memref<16x256xf32, #tpu.memory_space<vmem>>, vector<2x256xf32>
    %cst_62 = arith.constant dense<0.000000e+00> : vector<2x256xf32>
    %214 = tpu.matmul %211, %7, %cst_62 {dimension_numbers = #tpu.dot_dimension_numbers<[1], [0], [0], [1], [0, 0, 1, 1], [], []>} : vector<2x64xf32>, vector<64x256xf32>, vector<2x256xf32> -> vector<2x256xf32>
    %215 = arith.addf %213, %214 : vector<2x256xf32>
    %216 = vector.extract_strided_slice %215 {offsets = [0, 0], sizes = [2, 64], strides = [1, 1]} : vector<2x256xf32> to vector<2x64xf32>
    %217 = arith.negf %216 : vector<2x64xf32>
    %218 = math.exp %217 : vector<2x64xf32>
    %cst_63 = arith.constant 1.000000e+00 : f32
    %219 = vector.broadcast %cst_63 : f32 to vector<2x64xf32>
    %220 = arith.addf %219, %218 : vector<2x64xf32>
    %221 = arith.divf %219, %220 : vector<2x64xf32>
    %222 = vector.extract_strided_slice %215 {offsets = [0, 64], sizes = [2, 64], strides = [1, 1]} : vector<2x256xf32> to vector<2x64xf32>
    %223 = arith.negf %222 : vector<2x64xf32>
    %224 = math.exp %223 : vector<2x64xf32>
    %cst_64 = arith.constant 1.000000e+00 : f32
    %225 = vector.broadcast %cst_64 : f32 to vector<2x64xf32>
    %226 = arith.addf %225, %224 : vector<2x64xf32>
    %227 = arith.divf %225, %226 : vector<2x64xf32>
    %228 = vector.extract_strided_slice %215 {offsets = [0, 128], sizes = [2, 64], strides = [1, 1]} : vector<2x256xf32> to vector<2x64xf32>
    %229 = math.tanh %228 : vector<2x64xf32>
    %230 = vector.extract_strided_slice %215 {offsets = [0, 192], sizes = [2, 64], strides = [1, 1]} : vector<2x256xf32> to vector<2x64xf32>
    %231 = arith.negf %230 : vector<2x64xf32>
    %232 = math.exp %231 : vector<2x64xf32>
    %cst_65 = arith.constant 1.000000e+00 : f32
    %233 = vector.broadcast %cst_65 : f32 to vector<2x64xf32>
    %234 = arith.addf %233, %232 : vector<2x64xf32>
    %235 = arith.divf %233, %234 : vector<2x64xf32>
    %236 = arith.mulf %227, %209 : vector<2x64xf32>
    %237 = arith.mulf %221, %229 : vector<2x64xf32>
    %238 = arith.addf %236, %237 : vector<2x64xf32>
    %239 = math.tanh %238 : vector<2x64xf32>
    %240 = arith.mulf %235, %239 : vector<2x64xf32>
    %c14_66 = arith.constant 14 : index
    %c0_67 = arith.constant 0 : index
    %241 = vector.load %arg4[%c14_66, %c0_67] : memref<16x64xf32, #tpu.memory_space<vmem>>, vector<2x64xf32>
    tpu.vector_store %arg4[%c14_66, %c0_67], %240 {strides = array<i32>} : memref<16x64xf32, #tpu.memory_space<vmem>>, vector<2x64xf32>,
    return
  }
}

</mosaic_0001>

<bundles_post_ra>
// kernel: cudnn_rnn_pallas.2
= control target key start
LH: loop header
LB: loop body
LE: loop exit
PB: predicated region body
PF: predicated region fallthrough
CT: control target
= control target key end

     0   :  { %v1187_v3 = vmov 0.0   ;;  %vm47_vm0 = vcmask 523264   ;;  %v37_v34 = vlaneseq  ;;  %vm255_vm1 = vcmask 517120   ;;  %s1568_s1 = inlined_call_operand.vmem [shape: f32[64,256], index: 1, kind: input, shape index: {}]   ;;  %s1569_s2 = inlined_call_operand.vmem [shape: f32[64,256], index: 2, kind: input, shape index: {}]   ;;  %s1570_s0 = inlined_call_operand.vmem [shape: f32[16,64], index: 0, kind: input, shape index: {}]   ;;  %s1571_s3 = inlined_call_operand.vmem [shape: f32[1,256], index: 3, kind: input, shape index: {}]   ;;  %s1572_s4 = inlined_call_operand.vmem [shape: f32[16,64], index: 4, kind: output, shape index: {}]  }
   0x1   :  { %v34_v0 = vld [vmem:[%s1568_s1 + $0x78] sm:$0xff]  ;;  %v33_v1 = vld [vmem:[%s1568_s1 + $0x70] sm:$0xff]  ;;  %v32_v2 = vld [vmem:[%s1568_s1 + $0x68] sm:$0xff]  ;;  %118 = vmatprep.mubr.f32.mxu0 %v1187_v3  ;;  %220 = vmatprep.mubr.f32.mxu1 %v1187_v3  ;;  %vm369_vm2 = vcmask 519170   ;;  %vm603_vm3 = vcmask 523270   ;;  %vm486_vm4 = vcmask 521220  }
   0x2   :  { %70 = vmatprep.subr.mxu0 %v34_v0  ;;  %v31_v4 = vld [vmem:[%s1568_s1 + $0x60] sm:$0xff]  ;;  %v30_v5 = vld [vmem:[%s1568_s1 + $0x58] sm:$0xff]  ;;  %v29_v6 = vld [vmem:[%s1568_s1 + $0x50] sm:$0xff]  ;;  %v38_v35 = vshrl.u32 %v37_v34, 7 }
   0x3   :  { %71 = vmatpush1.msra.mxu0 %v33_v1  ;;  %v1237_v7 = vld [vmem:[%s1569_s2 + $0x78] sm:$0xff]  ;;  %v1242_v8 = vld [vmem:[%s1569_s2 + $0x70] sm:$0xff]  ;;  %v28_v9 = vld [vmem:[%s1568_s1 + $0x48] sm:$0xff] }
   0x4   :  { %72 = vmatprep.subr.mxu0 %v32_v2  ;;  %172 = vmatprep.subr.mxu1 %v1237_v7  ;;  %v1251_v10 = vld [vmem:[%s1569_s2 + $0x68] sm:$0xff]  ;;  %v27_v11 = vld [vmem:[%s1568_s1 + $0x40] sm:$0xff]  ;;  %v1265_v13 = vld [vmem:[%s1569_s2 + $0x58] sm:$0xff]  ;;  %v39_v36 = vsub.s32 0, %v38_v35  ;;  %v43_v38 = vsub.s32 1, %v38_v35 }
   0x5   :  { %73 = vmatpush1.msra.mxu0 %v31_v4  ;;  %173 = vmatpush1.msra.mxu1 %v1242_v8  ;;  %v1260_v12 = vld [vmem:[%s1569_s2 + $0x60] sm:$0xff]  ;;  %v26_v14 = vld [vmem:[%s1568_s1 + $0x38] sm:$0xff]  ;;  %v1274_v15 = vld [vmem:[%s1569_s2 + $0x50] sm:$0xff] }
   0x6   :  { %74 = vmatprep.subr.mxu0 %v30_v5  ;;  %174 = vmatprep.subr.mxu1 %v1251_v10  ;;  %v25_v16 = vld [vmem:[%s1568_s1 + $0x30] sm:$0xff]  ;;  %v1283_v17 = vld [vmem:[%s1569_s2 + $0x48] sm:$0xff]  ;;  %v1292_v19 = vld [vmem:[%s1569_s2 + $0x40] sm:$0xff] }
   0x7   :  { %75 = vmatpush1.msra.mxu0 %v29_v6  ;;  %175 = vmatpush1.msra.mxu1 %v1260_v12  ;;  %v24_v18 = vld [vmem:[%s1568_s1 + $0x28] sm:$0xff]  ;;  %v23_v20 = vld [vmem:[%s1568_s1 + $0x20] sm:$0xff]  ;;  %v1301_v21 = vld [vmem:[%s1569_s2 + $0x38] sm:$0xff] }
   0x8   :  { %76 = vmatprep.subr.mxu0 %v28_v9  ;;  %176 = vmatprep.subr.mxu1 %v1265_v13  ;;  %v22_v22 = vld [vmem:[%s1568_s1 + $0x18] sm:$0xff]  ;;  %v1310_v23 = vld [vmem:[%s1569_s2 + $0x30] sm:$0xff]  ;;  %v1319_v25 = vld [vmem:[%s1569_s2 + $0x28] sm:$0xff] }
   0x9   :  { %77 = vmatpush1.msra.mxu0 %v27_v11  ;;  %177 = vmatpush1.msra.mxu1 %v1274_v15  ;;  %v21_v24 = vld [vmem:[%s1568_s1 + $0x10] sm:$0xff]  ;;  %v20_v26 = vld [vmem:[%s1568_s1 + $0x8] sm:$0xff]  ;;  %v1328_v27 = vld [vmem:[%s1569_s2 + $0x20] sm:$0xff] }
   0xa   :  { %78 = vmatprep.subr.mxu0 %v26_v14  ;;  %178 = vmatprep.subr.mxu1 %v1283_v17  ;;  %v19_v28 = vld [vmem:[%s1568_s1] sm:$0xff]  ;;  %v1337_v29 = vld [vmem:[%s1569_s2 + $0x18] sm:$0xff]  ;;  %v1346_v31 = vld [vmem:[%s1569_s2 + $0x10] sm:$0xff] }
   0xb   :  { %79 = vmatpush1.msra.mxu0 %v25_v16  ;;  %179 = vmatpush1.msra.mxu1 %v1292_v19  ;;  %v17_v30 = vld [vmem:[%s1570_s0] sm:$0xff]  ;;  %v1352_v32 = vld [vmem:[%s1569_s2 + $0x8] sm:$0xff] }
   0xc   :  { %80 = vmatprep.subr.mxu0 %v24_v18  ;;  %180 = vmatprep.subr.mxu1 %v1301_v21  ;;  %v1358_v33 = vld [vmem:[%s1569_s2] sm:$0xff]  ;;  %v18_v57 = vld [vmem:[%s1570_s0 + $0x8] sm:$0xff] }
   0xd   :  { %81 = vmatpush1.msra.mxu0 %v23_v20  ;;  %181 = vmatpush1.msra.mxu1 %v1310_v23  ;;  %v35_v37 = vld [vmem:[%s1571_s3] sm:$0x3]  ;;  %s1188_s3 = smov 64  }
   0xe   :  { %82 = vmatprep.subr.mxu0 %v22_v22  ;;  %182 = vmatprep.subr.mxu1 %v1319_v25  ;;  %v40_v39 = vrot.slane %v35_v37, %v39_v36  ;;  %v44_v40 = vrot.slane %v35_v37, %v43_v38 }
   0xf   :  { %83 = vmatpush1.msra.mxu0 %v21_v24  ;;  %183 = vmatpush1.msra.mxu1 %v1328_v27 }
  0x10   :  { %84 = vmatprep.subr.mxu0 %v20_v26  ;;  %184 = vmatprep.subr.mxu1 %v1337_v29 }
  0x11   :  { %85 = vmatpush1.msra.mxu0 %v19_v28  ;;  %185 = vmatpush1.msra.mxu1 %v1346_v31 }
  0x12   :  { %1064 = vmatmul.mubr.msk.f32.vlgmr.msra.gmra.mxu0 %vm47_vm0, %v17_v30  ;;  %186 = vmatprep.subr.mxu1 %v1352_v32 }
  0x13   :  { %277 = vmatprep.subr.mxu0 %v1237_v7  ;;  %187 = vmatpush1.msra.mxu1 %v1358_v33 }
  0x14   :  { %278 = vmatpush1.msra.mxu0 %v1242_v8  ;;  %221 = vmatmul.mubr.f32.vlgmr.msra.gmra.mxu1 %v1187_v3 }
  0x15   :  { %279 = vmatprep.subr.mxu0 %v1251_v10  ;;  %124 = vmatprep.mubr.f32.mxu0 %v1187_v3 }
  0x16   :  { %280 = vmatpush1.msra.mxu0 %v1260_v12  ;;  %394 = vmatprep.subr.mxu1 %v1237_v7 }
  0x17   :  { %281 = vmatprep.subr.mxu0 %v1265_v13  ;;  %395 = vmatpush1.msra.mxu1 %v1242_v8 }
  0x18   :  { %282 = vmatpush1.msra.mxu0 %v1274_v15  ;;  %396 = vmatprep.subr.mxu1 %v1251_v10 }
  0x19   :  { %283 = vmatprep.subr.mxu0 %v1283_v17  ;;  %397 = vmatpush1.msra.mxu1 %v1260_v12 }
  0x1a   :  { %284 = vmatpush1.msra.mxu0 %v1292_v19  ;;  %398 = vmatprep.subr.mxu1 %v1265_v13 }
  0x1b   :  { %285 = vmatprep.subr.mxu0 %v1301_v21  ;;  %399 = vmatpush1.msra.mxu1 %v1274_v15 }
  0x1c   :  { %286 = vmatpush1.msra.mxu0 %v1310_v23  ;;  %400 = vmatprep.subr.mxu1 %v1283_v17 }
  0x1d   :  { %287 = vmatprep.subr.mxu0 %v1319_v25  ;;  %401 = vmatpush1.msra.mxu1 %v1292_v19 }
  0x1e   :  { %288 = vmatpush1.msra.mxu0 %v1328_v27  ;;  %402 = vmatprep.subr.mxu1 %v1301_v21 }
  0x1f   :  { %289 = vmatprep.subr.mxu0 %v1337_v29  ;;  %403 = vmatpush1.msra.mxu1 %v1310_v23 }
  0x20   :  { %290 = vmatpush1.msra.mxu0 %v1346_v31  ;;  %404 = vmatprep.subr.mxu1 %v1319_v25 }
  0x21   :  { %291 = vmatprep.subr.mxu0 %v1352_v32  ;;  %405 = vmatpush1.msra.mxu1 %v1328_v27 }
  0x22   :  { %292 = vmatpush1.msra.mxu0 %v1358_v33  ;;  %406 = vmatprep.subr.mxu1 %v1337_v29 }
  0x23   :  { %442 = vmatprep.mubr.f32.mxu1 %v1187_v3  ;;  %407 = vmatpush1.msra.mxu1 %v1346_v31 }
  0x24   :  { %511 = vmatprep.subr.mxu0 %v1237_v7  ;;  %408 = vmatprep.subr.mxu1 %v1352_v32 }
  0x25   :  { %409 = vmatpush1.msra.mxu1 %v1358_v33  ;;  %1065 = vmatmul.mubr.msk.f32.gmra.mxu0 %vm47_vm0, %v18_v57 }
  0x26   :  { %628 = vmatprep.subr.mxu1 %v1237_v7  ;;  %325 = vmatprep.mubr.f32.mxu0 %v1187_v3 }
  0xd2   :  { %v120_v41 = vpop.f32.mrf.mxu0 }
  0xd3   :  { %v121_v42 = vadd.f32 %v120_v41, %v40_v39 }
  0xd4   :  { %v122_v43 = vpop.f32.mrf.mxu0  ;;  %v222_v46 = vpop.f32.mrf.mxu1 }
  0xd5   :  { %131 = vst [vmem:[#allocation2 + $0x10] sm:$0xff] %v121_v42  ;;  %v123_v44 = vadd.f32 %v122_v43, %v44_v40 }
  0xd6   :  { %v224_v50 = vpop.f32.mrf.mxu1 }
  0xd7   :  { %132 = vst [vmem:[#allocation2] sm:$0xff] %v123_v44 }
  0xdc   :  { %v151_v45 = vld [vmem:[#allocation2 + $0x10] sm:$0x3]  ;;  %v257_v18 = vld [vmem:[#allocation2 + $0x10] sm:$0xc] }
  0xdd   :  { %v227_v47 = vadd.f32 %v222_v46, %v151_v45 }
  0xde   :  { %v152_v49 = vld [vmem:[#allocation2] sm:$0x3]  ;;  %v258_v28 = vld [vmem:[#allocation2] sm:$0xc] }
  0xdf   :  { %v1066_v48 = vmul.f32 -1.442695, %v227_v47  ;;  %v228_v51 = vadd.f32 %v224_v50, %v152_v49 }
  0xe1   :  { %1091 = vpow2.f32 %v1066_v48  ;;  %v1067_v58 = vmul.f32 -1.442695, %v228_v51 }
  0xe2   :  { %1093 = vtanh.f32 %v228_v51 }
  0xe5   :  { %v126_v4 = vpop.f32.mrf.mxu0 }
  0xe6   :  { %v127_v5 = vadd.f32 %v126_v4, %v40_v39 }
  0xe7   :  { %v128_v6 = vpop.f32.mrf.mxu0 }
  0xe8   :  { %133 = vst [vmem:[#allocation2 + $0x18] sm:$0xff] %v127_v5  ;;  %v129_v9 = vadd.f32 %v128_v6, %v44_v40 }
  0xea   :  { %134 = vst [vmem:[#allocation2 + $0x8] sm:$0xff] %v129_v9 }
  0xee   :  { %v1092_v52 = vpop.eup %1091 }
  0xef   :  { %v232_v53 = vadd.f32 1.0, %v1092_v52  ;;  %v1094_v54 = vpop.eup %1093 }
  0xf1   :  { %1095 = vrcp.f32 %v232_v53  ;;  %v371_v53 = vld [vmem:[#allocation2 + $0x10] sm:$0x30] }
  0xf2   :  { %1097 = vpow2.f32 %v1067_v58  ;;  %v372_v58 = vld [vmem:[#allocation2] sm:$0x30] }
  0xfe   :  { %v1096_v55 = vpop.eup %1095 }
  0xff   :  { %v243_v56 = vmul.f32 %v1096_v55, %v1094_v54  ;;  %v1098_v59 = vpop.eup %1097  ;;  %v242_v61 = vmul.f32 0.0, %v1096_v55 }
 0x100   :  { %v239_v60 = vadd.f32 1.0, %v1098_v59 }
 0x101   :  { %245 = vrot.lane.b32.xlu0 %v243_v56, %s1188_s3 }
 0x102   :  { %1099 = vrcp.f32 %v239_v60 }
 0x10f   :  { %v1100_v0 = vpop.eup %1099 }
 0x173   :  { %v246_v62 = vpop.permute.xlu0 %245 }
 0x174   :  { %v248_v63 = vadd.f32 %v246_v62, %v242_v61 }
 0x176   :  { %1101 = vtanh.f32 %v248_v63  ;;  %v354_v37 = vrot.slane %v248_v63, 6 }
 0x183   :  { %v1102_v1 = vpop.eup %1101 }
 0x184   :  { %v250_v2 = vmul.f32 %v1102_v1, %v1100_v0 }
 0x186   :  { %252 = vrot.lane.b32.xlu0 %v250_v2, %s1188_s3 }
 0x1f8   :  { %v253_v11 = vpop.permute.xlu0 %252 }
 0x1f9   :  { %256 = vst.msk [vmem:[%s1572_s4] sm:$0x3] %vm255_vm1, %v253_v11  ;;  %1068 = vmatmul.mubr.msk.f32.vlgmr.msra.gmra.mxu0 %vm47_vm0, %v253_v11 }
 0x1fa   :  { %512 = vmatpush1.msra.mxu0 %v1242_v8  ;;  %559 = vmatprep.mubr.f32.mxu0 %v1187_v3 }
 0x1fb   :  { %513 = vmatprep.subr.mxu0 %v1251_v10 }
 0x1fc   :  { %514 = vmatpush1.msra.mxu0 %v1260_v12 }
 0x1fd   :  { %515 = vmatprep.subr.mxu0 %v1265_v13 }
 0x1fe   :  { %516 = vmatpush1.msra.mxu0 %v1274_v15 }
 0x1ff   :  { %517 = vmatprep.subr.mxu0 %v1283_v17 }
 0x200   :  { %518 = vmatpush1.msra.mxu0 %v1292_v19 }
 0x201   :  { %519 = vmatprep.subr.mxu0 %v1301_v21 }
 0x202   :  { %520 = vmatpush1.msra.mxu0 %v1310_v23 }
 0x203   :  { %521 = vmatprep.subr.mxu0 %v1319_v25 }
 0x204   :  { %522 = vmatpush1.msra.mxu0 %v1328_v27 }
 0x205   :  { %523 = vmatprep.subr.mxu0 %v1337_v29 }
 0x206   :  { %524 = vmatpush1.msra.mxu0 %v1346_v31 }
 0x207   :  { %525 = vmatprep.subr.mxu0 %v1352_v32 }
 0x208   :  { %526 = vmatpush1.msra.mxu0 %v1358_v33 }
 0x209   :  { %735 = vmatprep.subr.mxu0 %v1237_v7 }
 0x2b9   :  { %v327_v14 = vpop.f32.mrf.mxu0 }
 0x2ba   :  { %v334_v16 = vrot.slane %v327_v14, 6 }
 0x2bb   :  { %v329_v24 = vpop.f32.mrf.mxu0 }
 0x2bc   :  { %v338_v20 = vadd.f32 %v334_v16, %v257_v18  ;;  %v335_v26 = vrot.slane %v329_v24, 6 }
 0x2be   :  { %v1069_v22 = vmul.f32 -1.442695, %v338_v20  ;;  %v339_v30 = vadd.f32 %v335_v26, %v258_v28  ;;  %v488_v28 = vld [vmem:[#allocation2 + $0x10] sm:$0xc0] }
 0x2c0   :  { %1103 = vpow2.f32 %v1069_v22  ;;  %v1070_v41 = vmul.f32 -1.442695, %v339_v30 }
 0x2c1   :  { %1105 = vtanh.f32 %v339_v30 }
 0x2cd   :  { %v1104_v34 = vpop.eup %1103 }
 0x2ce   :  { %v343_v35 = vadd.f32 1.0, %v1104_v34  ;;  %v1106_v36 = vpop.eup %1105 }
 0x2d0   :  { %1107 = vrcp.f32 %v343_v35 }
 0x2d1   :  { %1109 = vpow2.f32 %v1070_v41 }
 0x2dd   :  { %v1108_v38 = vpop.eup %1107 }
 0x2de   :  { %v357_v39 = vmul.f32 %v1108_v38, %v1106_v36  ;;  %v356_v40 = vmul.f32 %v1108_v38, %v354_v37  ;;  %v1110_v42 = vpop.eup %1109  ;;  %v489_v37 = vld [vmem:[#allocation2] sm:$0xc0] }
 0x2df   :  { %v350_v43 = vadd.f32 1.0, %v1110_v42 }
 0x2e0   :  { %359 = vrot.lane.b32.xlu1 %v357_v39, %s1188_s3 }
 0x2e1   :  { %1111 = vrcp.f32 %v350_v43 }
 0x2ee   :  { %v1112_v46 = vpop.eup %1111 }
 0x352   :  { %v360_v44 = vpop.permute.xlu1 %359 }
 0x353   :  { %v362_v45 = vadd.f32 %v360_v44, %v356_v40 }
 0x355   :  { %1113 = vtanh.f32 %v362_v45  ;;  %v471_v63 = vrot.slane %v362_v45, 6 }
 0x362   :  { %v1114_v47 = vpop.eup %1113 }
 0x363   :  { %v1434_v48 = vmul.f32 %v1114_v47, %v1112_v46 }
 0x365   :  { %v373_v49 = vrot.slane %v1434_v48, 2 }
 0x367   :  { %374 = vrot.lane.b32.xlu1 %v373_v49, %s1188_s3 }
 0x3d9   :  { %v375_v50 = vpop.permute.xlu1 %374 }
 0x3da   :  { %1071 = vmatmul.mubr.msk.f32.vlgmr.msra.gmra.mxu1 %vm47_vm0, %v375_v50 }
 0x3db   :  { %629 = vmatpush1.msra.mxu1 %v1242_v8  ;;  %676 = vmatprep.mubr.f32.mxu1 %v1187_v3 }
 0x3dc   :  { %630 = vmatprep.subr.mxu1 %v1251_v10 }
 0x3dd   :  { %631 = vmatpush1.msra.mxu1 %v1260_v12 }
 0x3de   :  { %632 = vmatprep.subr.mxu1 %v1265_v13 }
 0x3df   :  { %633 = vmatpush1.msra.mxu1 %v1274_v15 }
 0x3e0   :  { %634 = vmatprep.subr.mxu1 %v1283_v17 }
 0x3e1   :  { %635 = vmatpush1.msra.mxu1 %v1292_v19 }
 0x3e2   :  { %636 = vmatprep.subr.mxu1 %v1301_v21 }
 0x3e3   :  { %637 = vmatpush1.msra.mxu1 %v1310_v23 }
 0x3e4   :  { %638 = vmatprep.subr.mxu1 %v1319_v25 }
 0x3e5   :  { %639 = vmatpush1.msra.mxu1 %v1328_v27 }
 0x3e6   :  { %640 = vmatprep.subr.mxu1 %v1337_v29 }
 0x3e7   :  { %641 = vmatpush1.msra.mxu1 %v1346_v31 }
 0x3e8   :  { %642 = vmatprep.subr.mxu1 %v1352_v32 }
 0x3e9   :  { %643 = vmatpush1.msra.mxu1 %v1358_v33 }
 0x3ea   :  { %851 = vmatprep.subr.mxu1 %v1237_v7 }
 0x49a   :  { %v444_v51 = vpop.f32.mrf.mxu1 }
 0x49b   :  { %v451_v52 = vrot.slane %v444_v51, 4 }
 0x49c   :  { %v446_v56 = vpop.f32.mrf.mxu1 }
 0x49d   :  { %v455_v54 = vadd.f32 %v451_v52, %v371_v53  ;;  %v452_v57 = vrot.slane %v446_v56, 4  ;;  %v605_v56 = vld [vmem:[#allocation2 + $0x18] sm:$0x3] }
 0x49f   :  { %v1072_v55 = vmul.f32 -1.442695, %v455_v54  ;;  %v456_v59 = vadd.f32 %v452_v57, %v372_v58 }
 0x4a1   :  { %1115 = vpow2.f32 %v1072_v55  ;;  %v1073_v4 = vmul.f32 -1.442695, %v456_v59 }
 0x4a2   :  { %1117 = vtanh.f32 %v456_v59 }
 0x4ae   :  { %v1116_v60 = vpop.eup %1115 }
 0x4af   :  { %v460_v61 = vadd.f32 1.0, %v1116_v60  ;;  %v1118_v62 = vpop.eup %1117 }
 0x4b1   :  { %1119 = vrcp.f32 %v460_v61  ;;  %v606_v61 = vld [vmem:[#allocation2 + $0x8] sm:$0x3] }
 0x4b2   :  { %1121 = vpow2.f32 %v1073_v4 }
 0x4be   :  { %v1120_v0 = vpop.eup %1119 }
 0x4bf   :  { %v474_v1 = vmul.f32 %v1120_v0, %v1118_v62  ;;  %v473_v2 = vmul.f32 %v1120_v0, %v471_v63  ;;  %v1122_v5 = vpop.eup %1121 }
 0x4c0   :  { %v467_v6 = vadd.f32 1.0, %v1122_v5 }
 0x4c1   :  { %476 = vrot.lane.b32.xlu0 %v474_v1, %s1188_s3 }
 0x4c2   :  { %1123 = vrcp.f32 %v467_v6 }
 0x4cf   :  { %v1124_v14 = vpop.eup %1123 }
 0x533   :  { %v477_v9 = vpop.permute.xlu0 %476 }
 0x534   :  { %v479_v11 = vadd.f32 %v477_v9, %v473_v2 }
 0x536   :  { %1125 = vtanh.f32 %v479_v11  ;;  %v588_v42 = vrot.slane %v479_v11, 6 }
 0x543   :  { %v1126_v16 = vpop.eup %1125 }
 0x544   :  { %v1457_v18 = vmul.f32 %v1126_v16, %v1124_v14 }
 0x546   :  { %v490_v20 = vrot.slane %v1457_v18, 4 }
 0x548   :  { %491 = vrot.lane.b32.xlu1 %v490_v20, %s1188_s3 }
 0x5ba   :  { %v492_v22 = vpop.permute.xlu1 %491 }
 0x5bb   :  { %1074 = vmatmul.mubr.msk.f32.vlgmr.msra.gmra.mxu0 %vm47_vm0, %v492_v22 }
 0x5bc   :  { %736 = vmatpush1.msra.mxu0 %v1242_v8  ;;  %783 = vmatprep.mubr.f32.mxu0 %v1187_v3 }
 0x5bd   :  { %737 = vmatprep.subr.mxu0 %v1251_v10 }
 0x5be   :  { %738 = vmatpush1.msra.mxu0 %v1260_v12 }
 0x5bf   :  { %739 = vmatprep.subr.mxu0 %v1265_v13 }
 0x5c0   :  { %740 = vmatpush1.msra.mxu0 %v1274_v15 }
 0x5c1   :  { %741 = vmatprep.subr.mxu0 %v1283_v17 }
 0x5c2   :  { %742 = vmatpush1.msra.mxu0 %v1292_v19 }
 0x5c3   :  { %743 = vmatprep.subr.mxu0 %v1301_v21 }
 0x5c4   :  { %744 = vmatpush1.msra.mxu0 %v1310_v23 }
 0x5c5   :  { %745 = vmatprep.subr.mxu0 %v1319_v25 }
 0x5c6   :  { %746 = vmatpush1.msra.mxu0 %v1328_v27 }
 0x5c7   :  { %747 = vmatprep.subr.mxu0 %v1337_v29 }
 0x5c8   :  { %748 = vmatpush1.msra.mxu0 %v1346_v31 }
 0x5c9   :  { %749 = vmatprep.subr.mxu0 %v1352_v32 }
 0x5ca   :  { %750 = vmatpush1.msra.mxu0 %v1358_v33 }
 0x5cb   :  { %967 = vmatprep.subr.mxu0 %v1237_v7 }
 0x67b   :  { %v561_v24 = vpop.f32.mrf.mxu0 }
 0x67c   :  { %v568_v26 = vrot.slane %v561_v24, 2 }
 0x67d   :  { %v563_v35 = vpop.f32.mrf.mxu0 }
 0x67e   :  { %v572_v30 = vadd.f32 %v568_v26, %v488_v28  ;;  %v569_v36 = vrot.slane %v563_v35, 2 }
 0x680   :  { %v1075_v34 = vmul.f32 -1.442695, %v572_v30  ;;  %v573_v38 = vadd.f32 %v569_v36, %v489_v37 }
 0x682   :  { %1127 = vpow2.f32 %v1075_v34  ;;  %v1076_v7 = vmul.f32 -1.442695, %v573_v38 }
 0x683   :  { %1129 = vtanh.f32 %v573_v38 }
 0x68f   :  { %v1128_v39 = vpop.eup %1127 }
 0x690   :  { %v577_v40 = vadd.f32 1.0, %v1128_v39  ;;  %v1130_v41 = vpop.eup %1129 }
 0x692   :  { %1131 = vrcp.f32 %v577_v40 }
 0x693   :  { %1133 = vpow2.f32 %v1076_v7 }
 0x69f   :  { %v1132_v43 = vpop.eup %1131 }
 0x6a0   :  { %v591_v44 = vmul.f32 %v1132_v43, %v1130_v41  ;;  %v590_v45 = vmul.f32 %v1132_v43, %v588_v42  ;;  %v1134_v46 = vpop.eup %1133 }
 0x6a1   :  { %v584_v47 = vadd.f32 1.0, %v1134_v46 }
 0x6a2   :  { %593 = vrot.lane.b32.xlu0 %v591_v44, %s1188_s3 }
 0x6a3   :  { %1135 = vrcp.f32 %v584_v47 }
 0x6b0   :  { %v1136_v51 = vpop.eup %1135 }
 0x714   :  { %v594_v49 = vpop.permute.xlu0 %593 }
 0x715   :  { %v596_v50 = vadd.f32 %v594_v49, %v590_v45  ;;  %v828_v45 = vld [vmem:[#allocation2 + $0x18] sm:$0x30] }
 0x717   :  { %1137 = vtanh.f32 %v596_v50  ;;  %v699_v2 = vrot.slane %v596_v50, 6  ;;  %v829_v50 = vld [vmem:[#allocation2 + $0x8] sm:$0x30] }
 0x724   :  { %v1138_v52 = vpop.eup %1137 }
 0x725   :  { %v1480_v53 = vmul.f32 %v1138_v52, %v1136_v51 }
 0x727   :  { %v607_v54 = vrot.slane %v1480_v53, 6 }
 0x729   :  { %608 = vrot.lane.b32.xlu1 %v607_v54, %s1188_s3 }
 0x79b   :  { %v609_v55 = vpop.permute.xlu1 %608 }
 0x79c   :  { %1077 = vmatmul.mubr.msk.f32.vlgmr.msra.gmra.mxu1 %vm47_vm0, %v609_v55 }
 0x79d   :  { %852 = vmatpush1.msra.mxu1 %v1242_v8  ;;  %899 = vmatprep.mubr.f32.mxu1 %v1187_v3 }
 0x79e   :  { %853 = vmatprep.subr.mxu1 %v1251_v10 }
 0x79f   :  { %854 = vmatpush1.msra.mxu1 %v1260_v12 }
 0x7a0   :  { %855 = vmatprep.subr.mxu1 %v1265_v13 }
 0x7a1   :  { %856 = vmatpush1.msra.mxu1 %v1274_v15 }
 0x7a2   :  { %857 = vmatprep.subr.mxu1 %v1283_v17 }
 0x7a3   :  { %858 = vmatpush1.msra.mxu1 %v1292_v19 }
 0x7a4   :  { %859 = vmatprep.subr.mxu1 %v1301_v21 }
 0x7a5   :  { %860 = vmatpush1.msra.mxu1 %v1310_v23 }
 0x7a6   :  { %861 = vmatprep.subr.mxu1 %v1319_v25 }
 0x7a7   :  { %862 = vmatpush1.msra.mxu1 %v1328_v27 }
 0x7a8   :  { %863 = vmatprep.subr.mxu1 %v1337_v29 }
 0x7a9   :  { %864 = vmatpush1.msra.mxu1 %v1346_v31 }
 0x7aa   :  { %865 = vmatprep.subr.mxu1 %v1352_v32 }
 0x7ab   :  { %866 = vmatpush1.msra.mxu1 %v1358_v33 }
 0x85c   :  { %v678_v57 = vpop.f32.mrf.mxu1 }
 0x85d   :  { %v683_v58 = vadd.f32 %v678_v57, %v605_v56 }
 0x85e   :  { %v680_v60 = vpop.f32.mrf.mxu1 }
 0x85f   :  { %v1078_v59 = vmul.f32 -1.442695, %v683_v58  ;;  %v684_v62 = vadd.f32 %v680_v60, %v606_v61 }
 0x861   :  { %1139 = vpow2.f32 %v1078_v59  ;;  %v1079_v9 = vmul.f32 -1.442695, %v684_v62 }
 0x862   :  { %1141 = vtanh.f32 %v684_v62 }
 0x86e   :  { %v1140_v63 = vpop.eup %1139 }
 0x86f   :  { %v688_v0 = vadd.f32 1.0, %v1140_v63  ;;  %v1142_v1 = vpop.eup %1141 }
 0x871   :  { %1143 = vrcp.f32 %v688_v0 }
 0x872   :  { %1145 = vpow2.f32 %v1079_v9 }
 0x87e   :  { %v1144_v4 = vpop.eup %1143 }
 0x87f   :  { %v702_v5 = vmul.f32 %v1144_v4, %v1142_v1  ;;  %v701_v6 = vmul.f32 %v1144_v4, %v699_v2  ;;  %v1146_v11 = vpop.eup %1145 }
 0x880   :  { %v695_v14 = vadd.f32 1.0, %v1146_v11 }
 0x881   :  { %704 = vrot.lane.b32.xlu0 %v702_v5, %s1188_s3 }
 0x882   :  { %1147 = vrcp.f32 %v695_v14 }
 0x88f   :  { %v1148_v22 = vpop.eup %1147 }
 0x8f3   :  { %v705_v16 = vpop.permute.xlu0 %704 }
 0x8f4   :  { %v707_v20 = vadd.f32 %v705_v16, %v701_v6  ;;  %v944_v16 = vld [vmem:[#allocation2 + $0x18] sm:$0xc0] }
 0x8f6   :  { %1149 = vtanh.f32 %v707_v20 }
 0x903   :  { %v1150_v24 = vpop.eup %1149 }
 0x904   :  { %v709_v26 = vmul.f32 %v1150_v24, %v1148_v22 }
 0x906   :  { %711 = vrot.lane.b32.xlu1 %v709_v26, %s1188_s3 }
 0x978   :  { %v712_v28 = vpop.permute.xlu1 %711 }
 0x979   :  { %714 = vst.msk [vmem:[%s1572_s4 + $0x8] sm:$0x3] %vm255_vm1, %v712_v28  ;;  %1080 = vmatmul.mubr.msk.f32.vlgmr.msra.gmra.mxu0 %vm47_vm0, %v712_v28  ;;  %v945_v28 = vld [vmem:[#allocation2 + $0x8] sm:$0xc0] }
 0x97a   :  { %968 = vmatpush1.msra.mxu0 %v1242_v8  ;;  %1015 = vmatprep.mubr.f32.mxu0 %v1187_v3 }
 0x97b   :  { %969 = vmatprep.subr.mxu0 %v1251_v10  ;;  %v715_v10 = vld [vmem:[#allocation2 + $0x18] sm:$0xc] }
 0x97c   :  { %970 = vmatpush1.msra.mxu0 %v1260_v12 }
 0x97d   :  { %971 = vmatprep.subr.mxu0 %v1265_v13 }
 0x97e   :  { %972 = vmatpush1.msra.mxu0 %v1274_v15 }
 0x97f   :  { %973 = vmatprep.subr.mxu0 %v1283_v17 }
 0x980   :  { %974 = vmatpush1.msra.mxu0 %v1292_v19  ;;  %v716_v19 = vld [vmem:[#allocation2 + $0x8] sm:$0xc] }
 0x981   :  { %975 = vmatprep.subr.mxu0 %v1301_v21 }
 0x982   :  { %976 = vmatpush1.msra.mxu0 %v1310_v23 }
 0x983   :  { %977 = vmatprep.subr.mxu0 %v1319_v25 }
 0x984   :  { %978 = vmatpush1.msra.mxu0 %v1328_v27 }
 0x985   :  { %979 = vmatprep.subr.mxu0 %v1337_v29  ;;  %v812_v29 = vrot.slane %v707_v20, 6 }
 0x986   :  { %980 = vmatpush1.msra.mxu0 %v1346_v31 }
 0x987   :  { %981 = vmatprep.subr.mxu0 %v1352_v32 }
 0x988   :  { %982 = vmatpush1.msra.mxu0 %v1358_v33 }
 0xa39   :  { %v785_v3 = vpop.f32.mrf.mxu0 }
 0xa3a   :  { %v792_v8 = vrot.slane %v785_v3, 6 }
 0xa3b   :  { %v787_v15 = vpop.f32.mrf.mxu0 }
 0xa3c   :  { %v796_v12 = vadd.f32 %v792_v8, %v715_v10  ;;  %v793_v17 = vrot.slane %v787_v15, 6 }
 0xa3e   :  { %v1081_v13 = vmul.f32 -1.442695, %v796_v12  ;;  %v797_v21 = vadd.f32 %v793_v17, %v716_v19 }
 0xa40   :  { %1151 = vpow2.f32 %v1081_v13  ;;  %v1082_v33 = vmul.f32 -1.442695, %v797_v21 }
 0xa41   :  { %1153 = vtanh.f32 %v797_v21 }
 0xa4d   :  { %v1152_v23 = vpop.eup %1151 }
 0xa4e   :  { %v801_v25 = vadd.f32 1.0, %v1152_v23  ;;  %v1154_v27 = vpop.eup %1153 }
 0xa50   :  { %1155 = vrcp.f32 %v801_v25 }
 0xa51   :  { %1157 = vpow2.f32 %v1082_v33 }
 0xa5d   :  { %v1156_v31 = vpop.eup %1155 }
 0xa5e   :  { %v815_v32 = vmul.f32 %v1156_v31, %v1154_v27  ;;  %v814_v30 = vmul.f32 %v1156_v31, %v812_v29  ;;  %v1158_v34 = vpop.eup %1157 }
 0xa5f   :  { %v808_v35 = vadd.f32 1.0, %v1158_v34 }
 0xa60   :  { %817 = vrot.lane.b32.xlu0 %v815_v32, %s1188_s3 }
 0xa61   :  { %1159 = vrcp.f32 %v808_v35 }
 0xa6e   :  { %v1160_v38 = vpop.eup %1159 }
 0xad2   :  { %v818_v36 = vpop.permute.xlu0 %817 }
 0xad3   :  { %v820_v37 = vadd.f32 %v818_v36, %v814_v30 }
 0xad5   :  { %1161 = vtanh.f32 %v820_v37  ;;  %v928_v56 = vrot.slane %v820_v37, 6 }
 0xae2   :  { %v1162_v39 = vpop.eup %1161 }
 0xae3   :  { %v1525_v40 = vmul.f32 %v1162_v39, %v1160_v38 }
 0xae5   :  { %v830_v41 = vrot.slane %v1525_v40, 2 }
 0xae7   :  { %831 = vrot.lane.b32.xlu1 %v830_v41, %s1188_s3 }
 0xb59   :  { %v832_v42 = vpop.permute.xlu1 %831 }
 0xb5a   :  { %1083 = vmatmul.mubr.msk.f32.vlgmr.msra.gmra.mxu1 %vm47_vm0, %v832_v42 }
 0xc1a   :  { %v901_v43 = vpop.f32.mrf.mxu1 }
 0xc1b   :  { %v908_v44 = vrot.slane %v901_v43, 4 }
 0xc1c   :  { %v903_v47 = vpop.f32.mrf.mxu1 }
 0xc1d   :  { %v912_v7 = vadd.f32 %v908_v44, %v828_v45  ;;  %v909_v49 = vrot.slane %v903_v47, 4 }
 0xc1f   :  { %v1084_v46 = vmul.f32 -1.442695, %v912_v7  ;;  %v913_v51 = vadd.f32 %v909_v49, %v829_v50 }
 0xc21   :  { %1163 = vpow2.f32 %v1084_v46  ;;  %v1085_v60 = vmul.f32 -1.442695, %v913_v51 }
 0xc22   :  { %1165 = vtanh.f32 %v913_v51 }
 0xc2e   :  { %v1164_v52 = vpop.eup %1163 }
 0xc2f   :  { %v917_v54 = vadd.f32 1.0, %v1164_v52  ;;  %v1166_v55 = vpop.eup %1165 }
 0xc31   :  { %1167 = vrcp.f32 %v917_v54 }
 0xc32   :  { %1169 = vpow2.f32 %v1085_v60 }
 0xc3e   :  { %v1168_v57 = vpop.eup %1167 }
 0xc3f   :  { %v931_v58 = vmul.f32 %v1168_v57, %v1166_v55  ;;  %v930_v59 = vmul.f32 %v1168_v57, %v928_v56  ;;  %v1170_v61 = vpop.eup %1169 }
 0xc40   :  { %v924_v62 = vadd.f32 1.0, %v1170_v61 }
 0xc41   :  { %933 = vrot.lane.b32.xlu0 %v931_v58, %s1188_s3 }
 0xc42   :  { %1171 = vrcp.f32 %v924_v62 }
 0xc4f   :  { %v1172_v1 = vpop.eup %1171 }
 0xcb3   :  { %v934_v63 = vpop.permute.xlu0 %933 }
 0xcb4   :  { %v936_v0 = vadd.f32 %v934_v63, %v930_v59 }
 0xcb6   :  { %1173 = vtanh.f32 %v936_v0  ;;  %v1044_v13 = vrot.slane %v936_v0, 6 }
 0xcc3   :  { %v1174_v2 = vpop.eup %1173 }
 0xcc4   :  { %v938_v4 = vmul.f32 %v1174_v2, %v1172_v1 }
 0xcc6   :  { %v946_v5 = vrot.slane %v938_v4, 4 }
 0xcc8   :  { %947 = vrot.lane.b32.xlu1 %v946_v5, %s1188_s3 }
 0xccc   :  { %366 = vrot.lane.b32.xlu1 %v1434_v48, %s1188_s3 }
 0xcd0   :  { %600 = vrot.lane.b32.xlu1 %v1480_v53, %s1188_s3 }
 0xcd4   :  { %940 = vrot.lane.b32.xlu1 %v938_v4, %s1188_s3 }
 0xd3a   :  { %v948_v6 = vpop.permute.xlu1 %947 }
 0xd3b   :  { %1086 = vmatmul.mubr.msk.f32.vlgmr.msra.gmra.mxu0 %vm47_vm0, %v948_v6 }
 0xd3e   :  { %v367_v9 = vpop.permute.xlu1 %366 }
 0xd3f   :  { %370 = vst.msk [vmem:[%s1572_s4] sm:$0xc] %vm369_vm2, %v367_v9 }
 0xd42   :  { %v601_v11 = vpop.permute.xlu1 %600 }
 0xd43   :  { %604 = vst.msk [vmem:[%s1572_s4] sm:$0xc0] %vm603_vm3, %v601_v11 }
 0xd46   :  { %v941_v48 = vpop.permute.xlu1 %940 }
 0xd47   :  { %943 = vst.msk [vmem:[%s1572_s4 + $0x8] sm:$0x30] %vm486_vm4, %v941_v48 }
 0xdfb   :  { %v1017_v53 = vpop.f32.mrf.mxu0 }
 0xdfc   :  { %v1024_v14 = vrot.slane %v1017_v53, 2 }
 0xdfd   :  { %v1019_v24 = vpop.f32.mrf.mxu0 }
 0xdfe   :  { %v1028_v20 = vadd.f32 %v1024_v14, %v944_v16  ;;  %v1025_v26 = vrot.slane %v1019_v24, 2 }
 0xe00   :  { %v1087_v22 = vmul.f32 -1.442695, %v1028_v20  ;;  %v1029_v3 = vadd.f32 %v1025_v26, %v945_v28 }
 0xe02   :  { %1175 = vpow2.f32 %v1087_v22  ;;  %v1088_v21 = vmul.f32 -1.442695, %v1029_v3 }
 0xe03   :  { %1177 = vtanh.f32 %v1029_v3 }
 0xe0f   :  { %v1176_v8 = vpop.eup %1175 }
 0xe10   :  { %v1033_v10 = vadd.f32 1.0, %v1176_v8  ;;  %v1178_v12 = vpop.eup %1177 }
 0xe12   :  { %1179 = vrcp.f32 %v1033_v10 }
 0xe13   :  { %1181 = vpow2.f32 %v1088_v21 }
 0xe1f   :  { %v1180_v15 = vpop.eup %1179 }
 0xe20   :  { %v1047_v17 = vmul.f32 %v1180_v15, %v1178_v12  ;;  %v1046_v19 = vmul.f32 %v1180_v15, %v1044_v13  ;;  %v1182_v23 = vpop.eup %1181 }
 0xe21   :  { %v1040_v25 = vadd.f32 1.0, %v1182_v23 }
 0xe22   :  { %1049 = vrot.lane.b32.xlu0 %v1047_v17, %s1188_s3 }
 0xe23   :  { %1183 = vrcp.f32 %v1040_v25 }
 0xe26   :  { %483 = vrot.lane.b32.xlu0 %v1457_v18, %s1188_s3 }
 0xe2a   :  { %824 = vrot.lane.b32.xlu0 %v1525_v40, %s1188_s3 }
 0xe30   :  { %v1184_v18 = vpop.eup %1183 }
 0xe94   :  { %v1050_v27 = vpop.permute.xlu0 %1049 }
 0xe95   :  { %v1052_v29 = vadd.f32 %v1050_v27, %v1046_v19 }
 0xe97   :  { %1185 = vtanh.f32 %v1052_v29 }
 0xe98   :  { %v484_v31 = vpop.permute.xlu0 %483 }
 0xe99   :  { %487 = vst.msk [vmem:[%s1572_s4] sm:$0x30] %vm486_vm4, %v484_v31 }
 0xe9c   :  { %v825_v32 = vpop.permute.xlu0 %824 }
 0xe9d   :  { %827 = vst.msk [vmem:[%s1572_s4 + $0x8] sm:$0xc] %vm369_vm2, %v825_v32 }
 0xea4   :  { %v1186_v30 = vpop.eup %1185 }
 0xea5   :  { %v1054_v33 = vmul.f32 %v1186_v30, %v1184_v18 }
 0xea7   :  { %1056 = vrot.lane.b32.xlu0 %v1054_v33, %s1188_s3 }
 0xf19   :  { %v1057_v34 = vpop.permute.xlu0 %1056 }
 0xf1a   :  { %1059 = vst.msk [vmem:[%s1572_s4 + $0x8] sm:$0xc0] %vm603_vm3, %v1057_v34 }

// kernel: cudnn_rnn_pallas.3
= control target key start
LH: loop header
LB: loop body
LE: loop exit
PB: predicated region body
PF: predicated region fallthrough
CT: control target
= control target key end

     0   :  { %v1195_v3 = vmov 0.0   ;;  %v53_v50 = vlaneseq  ;;  %vm265_vm0 = vcmask 517120   ;;  %vm162_vm1 = vcmask 523264   ;;  %s1630_s1 = inlined_call_operand.vmem [shape: f32[128,256], index: 1, kind: input, shape index: {}]   ;;  %s1631_s2 = inlined_call_operand.vmem [shape: f32[64,256], index: 2, kind: input, shape index: {}]   ;;  %s1632_s0 = inlined_call_operand.vmem [shape: f32[16,128], index: 0, kind: input, shape index: {}]   ;;  %s1633_s3 = inlined_call_operand.vmem [shape: f32[1,256], index: 3, kind: input, shape index: {}]   ;;  %s1634_s4 = inlined_call_operand.vmem [shape: f32[16,64], index: 4, kind: output, shape index: {}]  }
   0x1   :  { %v50_v0 = vld [vmem:[%s1630_s1 + $0xf8] sm:$0xff]  ;;  %v49_v1 = vld [vmem:[%s1630_s1 + $0xf0] sm:$0xff]  ;;  %v48_v2 = vld [vmem:[%s1630_s1 + $0xe8] sm:$0xff]  ;;  %127 = vmatprep.mubr.f32.mxu0 %v1195_v3  ;;  %230 = vmatprep.mubr.f32.mxu1 %v1195_v3  ;;  %vm379_vm2 = vcmask 519170   ;;  %vm613_vm3 = vcmask 523270   ;;  %vm496_vm4 = vcmask 521220  }
   0x2   :  { %63 = vmatprep.subr.mxu0 %v50_v0  ;;  %v47_v4 = vld [vmem:[%s1630_s1 + $0xe0] sm:$0xff]  ;;  %v46_v5 = vld [vmem:[%s1630_s1 + $0xd8] sm:$0xff]  ;;  %v45_v6 = vld [vmem:[%s1630_s1 + $0xd0] sm:$0xff]  ;;  %v54_v51 = vshrl.u32 %v53_v50, 7 }
   0x3   :  { %64 = vmatpush1.msra.mxu0 %v49_v1  ;;  %v44_v7 = vld [vmem:[%s1630_s1 + $0xc8] sm:$0xff]  ;;  %v43_v8 = vld [vmem:[%s1630_s1 + $0xc0] sm:$0xff]  ;;  %v42_v9 = vld [vmem:[%s1630_s1 + $0xb8] sm:$0xff] }
   0x4   :  { %65 = vmatprep.subr.mxu0 %v48_v2  ;;  %v41_v10 = vld [vmem:[%s1630_s1 + $0xb0] sm:$0xff]  ;;  %v40_v11 = vld [vmem:[%s1630_s1 + $0xa8] sm:$0xff]  ;;  %v1260_v12 = vld [vmem:[%s1631_s2 + $0x78] sm:$0xff]  ;;  %v55_v52 = vsub.s32 0, %v54_v51  ;;  %v59_v54 = vsub.s32 1, %v54_v51 }
   0x5   :  { %66 = vmatpush1.msra.mxu0 %v47_v4  ;;  %v39_v13 = vld [vmem:[%s1630_s1 + $0xa0] sm:$0xff]  ;;  %182 = vmatprep.subr.mxu1 %v1260_v12  ;;  %v1269_v14 = vld [vmem:[%s1631_s2 + $0x70] sm:$0xff]  ;;  %v1274_v15 = vld [vmem:[%s1631_s2 + $0x68] sm:$0xff] }
   0x6   :  { %67 = vmatprep.subr.mxu0 %v46_v5  ;;  %v38_v16 = vld [vmem:[%s1630_s1 + $0x98] sm:$0xff]  ;;  %183 = vmatpush1.msra.mxu1 %v1269_v14  ;;  %v1283_v17 = vld [vmem:[%s1631_s2 + $0x60] sm:$0xff]  ;;  %v37_v18 = vld [vmem:[%s1630_s1 + $0x90] sm:$0xff] }
   0x7   :  { %68 = vmatpush1.msra.mxu0 %v45_v6  ;;  %184 = vmatprep.subr.mxu1 %v1274_v15  ;;  %v1292_v19 = vld [vmem:[%s1631_s2 + $0x58] sm:$0xff]  ;;  %v1297_v20 = vld [vmem:[%s1631_s2 + $0x50] sm:$0xff]  ;;  %v36_v21 = vld [vmem:[%s1630_s1 + $0x88] sm:$0xff] }
   0x8   :  { %69 = vmatprep.subr.mxu0 %v44_v7  ;;  %185 = vmatpush1.msra.mxu1 %v1283_v17  ;;  %v1306_v22 = vld [vmem:[%s1631_s2 + $0x48] sm:$0xff]  ;;  %v35_v23 = vld [vmem:[%s1630_s1 + $0x80] sm:$0xff]  ;;  %v34_v25 = vld [vmem:[%s1630_s1 + $0x78] sm:$0xff] }
   0x9   :  { %70 = vmatpush1.msra.mxu0 %v43_v8  ;;  %186 = vmatprep.subr.mxu1 %v1292_v19  ;;  %v1315_v24 = vld [vmem:[%s1631_s2 + $0x40] sm:$0xff]  ;;  %v1324_v26 = vld [vmem:[%s1631_s2 + $0x38] sm:$0xff]  ;;  %v33_v27 = vld [vmem:[%s1630_s1 + $0x70] sm:$0xff] }
   0xa   :  { %71 = vmatprep.subr.mxu0 %v42_v9  ;;  %187 = vmatpush1.msra.mxu1 %v1297_v20  ;;  %v1333_v28 = vld [vmem:[%s1631_s2 + $0x30] sm:$0xff]  ;;  %v32_v29 = vld [vmem:[%s1630_s1 + $0x68] sm:$0xff]  ;;  %v31_v31 = vld [vmem:[%s1630_s1 + $0x60] sm:$0xff] }
   0xb   :  { %72 = vmatpush1.msra.mxu0 %v41_v10  ;;  %188 = vmatprep.subr.mxu1 %v1306_v22  ;;  %v1342_v30 = vld [vmem:[%s1631_s2 + $0x28] sm:$0xff]  ;;  %v1351_v32 = vld [vmem:[%s1631_s2 + $0x20] sm:$0xff]  ;;  %v30_v33 = vld [vmem:[%s1630_s1 + $0x58] sm:$0xff] }
   0xc   :  { %73 = vmatprep.subr.mxu0 %v40_v11  ;;  %189 = vmatpush1.msra.mxu1 %v1315_v24  ;;  %v1360_v34 = vld [vmem:[%s1631_s2 + $0x18] sm:$0xff]  ;;  %v29_v35 = vld [vmem:[%s1630_s1 + $0x50] sm:$0xff]  ;;  %v28_v37 = vld [vmem:[%s1630_s1 + $0x48] sm:$0xff] }
   0xd   :  { %74 = vmatpush1.msra.mxu0 %v39_v13  ;;  %190 = vmatprep.subr.mxu1 %v1324_v26  ;;  %v1369_v36 = vld [vmem:[%s1631_s2 + $0x10] sm:$0xff]  ;;  %v1378_v38 = vld [vmem:[%s1631_s2 + $0x8] sm:$0xff]  ;;  %v27_v39 = vld [vmem:[%s1630_s1 + $0x40] sm:$0xff] }
   0xe   :  { %75 = vmatprep.subr.mxu0 %v38_v16  ;;  %191 = vmatpush1.msra.mxu1 %v1333_v28  ;;  %v1387_v40 = vld [vmem:[%s1631_s2] sm:$0xff]  ;;  %v26_v41 = vld [vmem:[%s1630_s1 + $0x38] sm:$0xff]  ;;  %v25_v42 = vld [vmem:[%s1630_s1 + $0x30] sm:$0xff] }
   0xf   :  { %76 = vmatpush1.msra.mxu0 %v37_v18  ;;  %192 = vmatprep.subr.mxu1 %v1342_v30  ;;  %v24_v43 = vld [vmem:[%s1630_s1 + $0x28] sm:$0xff]  ;;  %v23_v44 = vld [vmem:[%s1630_s1 + $0x20] sm:$0xff]  ;;  %v22_v45 = vld [vmem:[%s1630_s1 + $0x18] sm:$0xff] }
  0x10   :  { %77 = vmatprep.subr.mxu0 %v36_v21  ;;  %193 = vmatpush1.msra.mxu1 %v1351_v32  ;;  %v21_v46 = vld [vmem:[%s1630_s1 + $0x10] sm:$0xff]  ;;  %v20_v47 = vld [vmem:[%s1630_s1 + $0x8] sm:$0xff]  ;;  %v19_v48 = vld [vmem:[%s1630_s1] sm:$0xff] }
  0x11   :  { %78 = vmatpush1.msra.mxu0 %v35_v23  ;;  %194 = vmatprep.subr.mxu1 %v1360_v34  ;;  %v17_v49 = vld [vmem:[%s1632_s0] sm:$0xff] }
  0x12   :  { %79 = vmatprep.subr.mxu0 %v34_v25  ;;  %195 = vmatpush1.msra.mxu1 %v1369_v36  ;;  %v51_v53 = vld [vmem:[%s1633_s3] sm:$0x3]  ;;  %s1196_s3 = smov 64  }
  0x13   :  { %80 = vmatpush1.msra.mxu0 %v33_v27  ;;  %196 = vmatprep.subr.mxu1 %v1378_v38  ;;  %v1459_v55 = vrot.slane %v51_v53, %v55_v52  ;;  %v1461_v56 = vrot.slane %v51_v53, %v59_v54  ;;  %v18_v52 = vld [vmem:[%s1632_s0 + $0x8] sm:$0xff] }
  0x14   :  { %81 = vmatprep.subr.mxu0 %v32_v29  ;;  %197 = vmatpush1.msra.mxu1 %v1387_v40 }
  0x15   :  { %82 = vmatpush1.msra.mxu0 %v31_v31  ;;  %231 = vmatmul.mubr.f32.vlgmr.msra.gmra.mxu1 %v1195_v3 }
  0x16   :  { %83 = vmatprep.subr.mxu0 %v30_v33  ;;  %287 = vmatprep.subr.mxu1 %v1260_v12 }
  0x17   :  { %84 = vmatpush1.msra.mxu0 %v29_v35  ;;  %288 = vmatpush1.msra.mxu1 %v1269_v14 }
  0x18   :  { %85 = vmatprep.subr.mxu0 %v28_v37  ;;  %289 = vmatprep.subr.mxu1 %v1274_v15 }
  0x19   :  { %86 = vmatpush1.msra.mxu0 %v27_v39  ;;  %290 = vmatpush1.msra.mxu1 %v1283_v17 }
  0x1a   :  { %87 = vmatprep.subr.mxu0 %v26_v41  ;;  %291 = vmatprep.subr.mxu1 %v1292_v19 }
  0x1b   :  { %88 = vmatpush1.msra.mxu0 %v25_v42  ;;  %292 = vmatpush1.msra.mxu1 %v1297_v20 }
  0x1c   :  { %89 = vmatprep.subr.mxu0 %v24_v43  ;;  %293 = vmatprep.subr.mxu1 %v1306_v22 }
  0x1d   :  { %90 = vmatpush1.msra.mxu0 %v23_v44  ;;  %294 = vmatpush1.msra.mxu1 %v1315_v24 }
  0x1e   :  { %91 = vmatprep.subr.mxu0 %v22_v45  ;;  %295 = vmatprep.subr.mxu1 %v1324_v26 }
  0x1f   :  { %92 = vmatpush1.msra.mxu0 %v21_v46  ;;  %335 = vmatprep.mubr.f32.mxu1 %v1195_v3 }
  0x20   :  { %93 = vmatprep.subr.mxu0 %v20_v47  ;;  %296 = vmatpush1.msra.mxu1 %v1333_v28 }
  0x21   :  { %94 = vmatpush1.msra.mxu0 %v19_v48  ;;  %297 = vmatprep.subr.mxu1 %v1342_v30 }
  0x22   :  { %128 = vmatmul.mubr.f32.vlgmr.msra.gmra.mxu0 %v17_v49  ;;  %404 = vmatprep.subr.mxu0 %v1260_v12 }
  0x23   :  { %405 = vmatpush1.msra.mxu0 %v1269_v14  ;;  %298 = vmatpush1.msra.mxu1 %v1351_v32 }
  0x24   :  { %406 = vmatprep.subr.mxu0 %v1274_v15  ;;  %299 = vmatprep.subr.mxu1 %v1360_v34 }
  0x25   :  { %407 = vmatpush1.msra.mxu0 %v1283_v17  ;;  %300 = vmatpush1.msra.mxu1 %v1369_v36 }
  0x26   :  { %408 = vmatprep.subr.mxu0 %v1292_v19  ;;  %301 = vmatprep.subr.mxu1 %v1378_v38 }
  0x27   :  { %409 = vmatpush1.msra.mxu0 %v1297_v20  ;;  %302 = vmatpush1.msra.mxu1 %v1387_v40 }
  0x28   :  { %410 = vmatprep.subr.mxu0 %v1306_v22  ;;  %133 = vmatprep.mubr.f32.mxu0 %v1195_v3 }
  0x29   :  { %411 = vmatpush1.msra.mxu0 %v1315_v24  ;;  %521 = vmatprep.subr.mxu1 %v1260_v12 }
  0x2a   :  { %412 = vmatprep.subr.mxu0 %v1324_v26  ;;  %134 = vmatmul.mubr.f32.gmra.mxu0 %v18_v52 }
  0x2b   :  { %413 = vmatpush1.msra.mxu0 %v1333_v28  ;;  %452 = vmatprep.mubr.f32.mxu0 %v1195_v3 }
  0x2c   :  { %414 = vmatprep.subr.mxu0 %v1342_v30 }
  0x2d   :  { %415 = vmatpush1.msra.mxu0 %v1351_v32 }
  0x2e   :  { %416 = vmatprep.subr.mxu0 %v1360_v34 }
  0x2f   :  { %417 = vmatpush1.msra.mxu0 %v1369_v36 }
  0x30   :  { %418 = vmatprep.subr.mxu0 %v1378_v38 }
  0x31   :  { %419 = vmatpush1.msra.mxu0 %v1387_v40 }
  0x32   :  { %638 = vmatprep.subr.mxu0 %v1260_v12 }
  0xd5   :  { %v232_v62 = vpop.f32.mrf.mxu1 }
  0xd7   :  { %v234_v2 = vpop.f32.mrf.mxu1 }
  0xe2   :  { %v129_v57 = vpop.f32.mrf.mxu0 }
  0xe3   :  { %v130_v58 = vadd.f32 %v129_v57, %v1459_v55 }
  0xe4   :  { %v131_v59 = vpop.f32.mrf.mxu0 }
  0xe5   :  { %140 = vst [vmem:[#allocation2 + $0x10] sm:$0xff] %v130_v58  ;;  %v132_v60 = vadd.f32 %v131_v59, %v1461_v56 }
  0xe7   :  { %141 = vst [vmem:[#allocation2] sm:$0xff] %v132_v60 }
  0xec   :  { %v160_v61 = vld [vmem:[#allocation2 + $0x10] sm:$0x3]  ;;  %v267_v35 = vld [vmem:[#allocation2 + $0x10] sm:$0xc] }
  0xed   :  { %v237_v63 = vadd.f32 %v232_v62, %v160_v61 }
  0xee   :  { %v161_v1 = vld [vmem:[#allocation2] sm:$0x3]  ;;  %v268_v43 = vld [vmem:[#allocation2] sm:$0xc] }
  0xef   :  { %v1074_v0 = vmul.f32 -1.442695, %v237_v63  ;;  %v238_v4 = vadd.f32 %v234_v2, %v161_v1 }
  0xf1   :  { %1099 = vpow2.f32 %v1074_v0  ;;  %v1075_v10 = vmul.f32 -1.442695, %v238_v4  ;;  %v135_v0 = vpop.f32.mrf.mxu0 }
  0xf2   :  { %1101 = vtanh.f32 %v238_v4  ;;  %v136_v1 = vadd.f32 %v135_v0, %v1459_v55 }
  0xf3   :  { %v137_v2 = vpop.f32.mrf.mxu0 }
  0xf4   :  { %142 = vst [vmem:[#allocation2 + $0x18] sm:$0xff] %v136_v1  ;;  %v138_v4 = vadd.f32 %v137_v2, %v1461_v56 }
  0xf6   :  { %143 = vst [vmem:[#allocation2 + $0x8] sm:$0xff] %v138_v4 }
  0xfe   :  { %v1100_v5 = vpop.eup %1099 }
  0xff   :  { %v242_v6 = vadd.f32 1.0, %v1100_v5  ;;  %v1102_v7 = vpop.eup %1101 }
 0x101   :  { %1103 = vrcp.f32 %v242_v6  ;;  %v381_v6 = vld [vmem:[#allocation2 + $0x10] sm:$0x30] }
 0x102   :  { %1105 = vpow2.f32 %v1075_v10 }
 0x10e   :  { %v1104_v8 = vpop.eup %1103 }
 0x10f   :  { %v253_v9 = vmul.f32 %v1104_v8, %v1102_v7  ;;  %v1106_v11 = vpop.eup %1105  ;;  %v252_v16 = vmul.f32 0.0, %v1104_v8 }
 0x110   :  { %v249_v13 = vadd.f32 1.0, %v1106_v11  ;;  %v382_v11 = vld [vmem:[#allocation2] sm:$0x30] }
 0x111   :  { %255 = vrot.lane.b32.xlu0 %v253_v9, %s1196_s3 }
 0x112   :  { %1107 = vrcp.f32 %v249_v13 }
 0x11f   :  { %v1108_v23 = vpop.eup %1107 }
 0x183   :  { %v256_v18 = vpop.permute.xlu0 %255 }
 0x184   :  { %v258_v21 = vadd.f32 %v256_v18, %v252_v16 }
 0x186   :  { %1109 = vtanh.f32 %v258_v21  ;;  %v364_v48 = vrot.slane %v258_v21, 6 }
 0x193   :  { %v1110_v25 = vpop.eup %1109 }
 0x194   :  { %v260_v27 = vmul.f32 %v1110_v25, %v1108_v23 }
 0x196   :  { %262 = vrot.lane.b32.xlu0 %v260_v27, %s1196_s3 }
 0x208   :  { %v263_v29 = vpop.permute.xlu0 %262 }
 0x209   :  { %266 = vst.msk [vmem:[%s1634_s4] sm:$0x3] %vm265_vm0, %v263_v29  ;;  %1076 = vmatmul.mubr.msk.f32.vlgmr.msra.gmra.mxu1 %vm162_vm1, %v263_v29 }
 0x20a   :  { %522 = vmatpush1.msra.mxu1 %v1269_v14  ;;  %569 = vmatprep.mubr.f32.mxu1 %v1195_v3 }
 0x20b   :  { %523 = vmatprep.subr.mxu1 %v1274_v15 }
 0x20c   :  { %524 = vmatpush1.msra.mxu1 %v1283_v17 }
 0x20d   :  { %525 = vmatprep.subr.mxu1 %v1292_v19 }
 0x20e   :  { %526 = vmatpush1.msra.mxu1 %v1297_v20 }
 0x20f   :  { %527 = vmatprep.subr.mxu1 %v1306_v22 }
 0x210   :  { %528 = vmatpush1.msra.mxu1 %v1315_v24 }
 0x211   :  { %529 = vmatprep.subr.mxu1 %v1324_v26 }
 0x212   :  { %530 = vmatpush1.msra.mxu1 %v1333_v28 }
 0x213   :  { %531 = vmatprep.subr.mxu1 %v1342_v30 }
 0x214   :  { %532 = vmatpush1.msra.mxu1 %v1351_v32 }
 0x215   :  { %533 = vmatprep.subr.mxu1 %v1360_v34 }
 0x216   :  { %534 = vmatpush1.msra.mxu1 %v1369_v36 }
 0x217   :  { %535 = vmatprep.subr.mxu1 %v1378_v38 }
 0x218   :  { %536 = vmatpush1.msra.mxu1 %v1387_v40 }
 0x219   :  { %745 = vmatprep.subr.mxu1 %v1260_v12 }
 0x2c9   :  { %v337_v31 = vpop.f32.mrf.mxu1 }
 0x2ca   :  { %v344_v33 = vrot.slane %v337_v31, 6 }
 0x2cb   :  { %v339_v41 = vpop.f32.mrf.mxu1 }
 0x2cc   :  { %v348_v37 = vadd.f32 %v344_v33, %v267_v35  ;;  %v345_v42 = vrot.slane %v339_v41, 6 }
 0x2ce   :  { %v1077_v39 = vmul.f32 -1.442695, %v348_v37  ;;  %v349_v44 = vadd.f32 %v345_v42, %v268_v43 }
 0x2d0   :  { %1111 = vpow2.f32 %v1077_v39  ;;  %v1078_v53 = vmul.f32 -1.442695, %v349_v44 }
 0x2d1   :  { %1113 = vtanh.f32 %v349_v44 }
 0x2dd   :  { %v1112_v45 = vpop.eup %1111 }
 0x2de   :  { %v353_v46 = vadd.f32 1.0, %v1112_v45  ;;  %v1114_v47 = vpop.eup %1113 }
 0x2e0   :  { %1115 = vrcp.f32 %v353_v46 }
 0x2e1   :  { %1117 = vpow2.f32 %v1078_v53  ;;  %v499_v53 = vld [vmem:[#allocation2] sm:$0xc0] }
 0x2ed   :  { %v1116_v49 = vpop.eup %1115 }
 0x2ee   :  { %v367_v50 = vmul.f32 %v1116_v49, %v1114_v47  ;;  %v366_v51 = vmul.f32 %v1116_v49, %v364_v48  ;;  %v1118_v54 = vpop.eup %1117  ;;  %v498_v48 = vld [vmem:[#allocation2 + $0x10] sm:$0xc0] }
 0x2ef   :  { %v360_v57 = vadd.f32 1.0, %v1118_v54 }
 0x2f0   :  { %369 = vrot.lane.b32.xlu1 %v367_v50, %s1196_s3 }
 0x2f1   :  { %1119 = vrcp.f32 %v360_v57 }
 0x2fe   :  { %v1120_v60 = vpop.eup %1119 }
 0x362   :  { %v370_v58 = vpop.permute.xlu1 %369 }
 0x363   :  { %v372_v59 = vadd.f32 %v370_v58, %v366_v51 }
 0x365   :  { %1121 = vtanh.f32 %v372_v59  ;;  %v481_v23 = vrot.slane %v372_v59, 6 }
 0x372   :  { %v1122_v61 = vpop.eup %1121 }
 0x373   :  { %v1494_v62 = vmul.f32 %v1122_v61, %v1120_v60 }
 0x375   :  { %v383_v63 = vrot.slane %v1494_v62, 2 }
 0x377   :  { %384 = vrot.lane.b32.xlu1 %v383_v63, %s1196_s3 }
 0x3e9   :  { %v385_v5 = vpop.permute.xlu1 %384 }
 0x3ea   :  { %1079 = vmatmul.mubr.msk.f32.vlgmr.msra.gmra.mxu0 %vm162_vm1, %v385_v5 }
 0x3eb   :  { %639 = vmatpush1.msra.mxu0 %v1269_v14  ;;  %686 = vmatprep.mubr.f32.mxu0 %v1195_v3 }
 0x3ec   :  { %640 = vmatprep.subr.mxu0 %v1274_v15 }
 0x3ed   :  { %641 = vmatpush1.msra.mxu0 %v1283_v17 }
 0x3ee   :  { %642 = vmatprep.subr.mxu0 %v1292_v19 }
 0x3ef   :  { %643 = vmatpush1.msra.mxu0 %v1297_v20 }
 0x3f0   :  { %644 = vmatprep.subr.mxu0 %v1306_v22 }
 0x3f1   :  { %645 = vmatpush1.msra.mxu0 %v1315_v24 }
 0x3f2   :  { %646 = vmatprep.subr.mxu0 %v1324_v26 }
 0x3f3   :  { %647 = vmatpush1.msra.mxu0 %v1333_v28 }
 0x3f4   :  { %648 = vmatprep.subr.mxu0 %v1342_v30 }
 0x3f5   :  { %649 = vmatpush1.msra.mxu0 %v1351_v32 }
 0x3f6   :  { %650 = vmatprep.subr.mxu0 %v1360_v34 }
 0x3f7   :  { %651 = vmatpush1.msra.mxu0 %v1369_v36 }
 0x3f8   :  { %652 = vmatprep.subr.mxu0 %v1378_v38 }
 0x3f9   :  { %653 = vmatpush1.msra.mxu0 %v1387_v40 }
 0x3fa   :  { %861 = vmatprep.subr.mxu0 %v1260_v12 }
 0x4aa   :  { %v454_v55 = vpop.f32.mrf.mxu0 }
 0x4ab   :  { %v461_v56 = vrot.slane %v454_v55, 4 }
 0x4ac   :  { %v456_v9 = vpop.f32.mrf.mxu0 }
 0x4ad   :  { %v465_v7 = vadd.f32 %v461_v56, %v381_v6  ;;  %v462_v10 = vrot.slane %v456_v9, 4  ;;  %v615_v9 = vld [vmem:[#allocation2 + $0x18] sm:$0x3] }
 0x4af   :  { %v1080_v8 = vmul.f32 -1.442695, %v465_v7  ;;  %v466_v13 = vadd.f32 %v462_v10, %v382_v11 }
 0x4b1   :  { %1123 = vpow2.f32 %v1080_v8  ;;  %v1081_v31 = vmul.f32 -1.442695, %v466_v13 }
 0x4b2   :  { %1125 = vtanh.f32 %v466_v13 }
 0x4be   :  { %v1124_v16 = vpop.eup %1123 }
 0x4bf   :  { %v470_v18 = vadd.f32 1.0, %v1124_v16  ;;  %v1126_v21 = vpop.eup %1125 }
 0x4c1   :  { %1127 = vrcp.f32 %v470_v18  ;;  %v616_v18 = vld [vmem:[#allocation2 + $0x8] sm:$0x3] }
 0x4c2   :  { %1129 = vpow2.f32 %v1081_v31 }
 0x4ce   :  { %v1128_v25 = vpop.eup %1127 }
 0x4cf   :  { %v484_v27 = vmul.f32 %v1128_v25, %v1126_v21  ;;  %v483_v29 = vmul.f32 %v1128_v25, %v481_v23  ;;  %v1130_v33 = vpop.eup %1129 }
 0x4d0   :  { %v477_v35 = vadd.f32 1.0, %v1130_v33 }
 0x4d1   :  { %486 = vrot.lane.b32.xlu0 %v484_v27, %s1196_s3 }
 0x4d2   :  { %1131 = vrcp.f32 %v477_v35 }
 0x4df   :  { %v1132_v41 = vpop.eup %1131 }
 0x543   :  { %v487_v37 = vpop.permute.xlu0 %486 }
 0x544   :  { %v489_v39 = vadd.f32 %v487_v37, %v483_v29 }
 0x546   :  { %1133 = vtanh.f32 %v489_v39  ;;  %v598_v60 = vrot.slane %v489_v39, 6 }
 0x553   :  { %v1134_v42 = vpop.eup %1133 }
 0x554   :  { %v1519_v43 = vmul.f32 %v1134_v42, %v1132_v41 }
 0x556   :  { %v500_v44 = vrot.slane %v1519_v43, 4 }
 0x558   :  { %501 = vrot.lane.b32.xlu1 %v500_v44, %s1196_s3 }
 0x5ca   :  { %v502_v45 = vpop.permute.xlu1 %501 }
 0x5cb   :  { %1082 = vmatmul.mubr.msk.f32.vlgmr.msra.gmra.mxu1 %vm162_vm1, %v502_v45 }
 0x5cc   :  { %746 = vmatpush1.msra.mxu1 %v1269_v14  ;;  %793 = vmatprep.mubr.f32.mxu1 %v1195_v3 }
 0x5cd   :  { %747 = vmatprep.subr.mxu1 %v1274_v15 }
 0x5ce   :  { %748 = vmatpush1.msra.mxu1 %v1283_v17 }
 0x5cf   :  { %749 = vmatprep.subr.mxu1 %v1292_v19 }
 0x5d0   :  { %750 = vmatpush1.msra.mxu1 %v1297_v20 }
 0x5d1   :  { %751 = vmatprep.subr.mxu1 %v1306_v22 }
 0x5d2   :  { %752 = vmatpush1.msra.mxu1 %v1315_v24 }
 0x5d3   :  { %753 = vmatprep.subr.mxu1 %v1324_v26 }
 0x5d4   :  { %754 = vmatpush1.msra.mxu1 %v1333_v28 }
 0x5d5   :  { %755 = vmatprep.subr.mxu1 %v1342_v30 }
 0x5d6   :  { %756 = vmatpush1.msra.mxu1 %v1351_v32 }
 0x5d7   :  { %757 = vmatprep.subr.mxu1 %v1360_v34 }
 0x5d8   :  { %758 = vmatpush1.msra.mxu1 %v1369_v36 }
 0x5d9   :  { %759 = vmatprep.subr.mxu1 %v1378_v38 }
 0x5da   :  { %760 = vmatpush1.msra.mxu1 %v1387_v40 }
 0x5db   :  { %977 = vmatprep.subr.mxu1 %v1260_v12 }
 0x68b   :  { %v571_v46 = vpop.f32.mrf.mxu1 }
 0x68c   :  { %v578_v47 = vrot.slane %v571_v46, 2 }
 0x68d   :  { %v573_v51 = vpop.f32.mrf.mxu1 }
 0x68e   :  { %v582_v49 = vadd.f32 %v578_v47, %v498_v48  ;;  %v579_v52 = vrot.slane %v573_v51, 2 }
 0x690   :  { %v1083_v50 = vmul.f32 -1.442695, %v582_v49  ;;  %v583_v54 = vadd.f32 %v579_v52, %v499_v53 }
 0x692   :  { %1135 = vpow2.f32 %v1083_v50  ;;  %v1084_v12 = vmul.f32 -1.442695, %v583_v54 }
 0x693   :  { %1137 = vtanh.f32 %v583_v54 }
 0x69f   :  { %v1136_v57 = vpop.eup %1135 }
 0x6a0   :  { %v587_v58 = vadd.f32 1.0, %v1136_v57  ;;  %v1138_v59 = vpop.eup %1137 }
 0x6a2   :  { %1139 = vrcp.f32 %v587_v58 }
 0x6a3   :  { %1141 = vpow2.f32 %v1084_v12 }
 0x6af   :  { %v1140_v61 = vpop.eup %1139 }
 0x6b0   :  { %v601_v63 = vmul.f32 %v1140_v61, %v1138_v59  ;;  %v600_v0 = vmul.f32 %v1140_v61, %v598_v60  ;;  %v1142_v1 = vpop.eup %1141 }
 0x6b1   :  { %v594_v2 = vadd.f32 1.0, %v1142_v1 }
 0x6b2   :  { %603 = vrot.lane.b32.xlu0 %v601_v63, %s1196_s3 }
 0x6b3   :  { %1143 = vrcp.f32 %v594_v2 }
 0x6c0   :  { %v1144_v55 = vpop.eup %1143 }
 0x724   :  { %v604_v4 = vpop.permute.xlu0 %603 }
 0x725   :  { %v606_v5 = vadd.f32 %v604_v4, %v600_v0  ;;  %v838_v0 = vld [vmem:[#allocation2 + $0x18] sm:$0x30] }
 0x727   :  { %1145 = vtanh.f32 %v606_v5  ;;  %v709_v29 = vrot.slane %v606_v5, 6  ;;  %v839_v5 = vld [vmem:[#allocation2 + $0x8] sm:$0x30] }
 0x734   :  { %v1146_v56 = vpop.eup %1145 }
 0x735   :  { %v1542_v6 = vmul.f32 %v1146_v56, %v1144_v55 }
 0x737   :  { %v617_v7 = vrot.slane %v1542_v6, 6 }
 0x739   :  { %618 = vrot.lane.b32.xlu1 %v617_v7, %s1196_s3 }
 0x7ab   :  { %v619_v8 = vpop.permute.xlu1 %618 }
 0x7ac   :  { %1085 = vmatmul.mubr.msk.f32.vlgmr.msra.gmra.mxu0 %vm162_vm1, %v619_v8 }
 0x7ad   :  { %862 = vmatpush1.msra.mxu0 %v1269_v14  ;;  %909 = vmatprep.mubr.f32.mxu0 %v1195_v3 }
 0x7ae   :  { %863 = vmatprep.subr.mxu0 %v1274_v15 }
 0x7af   :  { %864 = vmatpush1.msra.mxu0 %v1283_v17 }
 0x7b0   :  { %865 = vmatprep.subr.mxu0 %v1292_v19 }
 0x7b1   :  { %866 = vmatpush1.msra.mxu0 %v1297_v20 }
 0x7b2   :  { %867 = vmatprep.subr.mxu0 %v1306_v22 }
 0x7b3   :  { %868 = vmatpush1.msra.mxu0 %v1315_v24 }
 0x7b4   :  { %869 = vmatprep.subr.mxu0 %v1324_v26 }
 0x7b5   :  { %870 = vmatpush1.msra.mxu0 %v1333_v28 }
 0x7b6   :  { %871 = vmatprep.subr.mxu0 %v1342_v30 }
 0x7b7   :  { %872 = vmatpush1.msra.mxu0 %v1351_v32 }
 0x7b8   :  { %873 = vmatprep.subr.mxu0 %v1360_v34 }
 0x7b9   :  { %874 = vmatpush1.msra.mxu0 %v1369_v36 }
 0x7ba   :  { %875 = vmatprep.subr.mxu0 %v1378_v38 }
 0x7bb   :  { %876 = vmatpush1.msra.mxu0 %v1387_v40 }
 0x86c   :  { %v688_v10 = vpop.f32.mrf.mxu0 }
 0x86d   :  { %v693_v11 = vadd.f32 %v688_v10, %v615_v9 }
 0x86e   :  { %v690_v16 = vpop.f32.mrf.mxu0 }
 0x86f   :  { %v1086_v13 = vmul.f32 -1.442695, %v693_v11  ;;  %v694_v21 = vadd.f32 %v690_v16, %v616_v18 }
 0x871   :  { %1147 = vpow2.f32 %v1086_v13  ;;  %v1087_v37 = vmul.f32 -1.442695, %v694_v21 }
 0x872   :  { %1149 = vtanh.f32 %v694_v21 }
 0x87e   :  { %v1148_v23 = vpop.eup %1147 }
 0x87f   :  { %v698_v25 = vadd.f32 1.0, %v1148_v23  ;;  %v1150_v27 = vpop.eup %1149 }
 0x881   :  { %1151 = vrcp.f32 %v698_v25 }
 0x882   :  { %1153 = vpow2.f32 %v1087_v37 }
 0x88e   :  { %v1152_v31 = vpop.eup %1151 }
 0x88f   :  { %v712_v33 = vmul.f32 %v1152_v31, %v1150_v27  ;;  %v711_v35 = vmul.f32 %v1152_v31, %v709_v29  ;;  %v1154_v39 = vpop.eup %1153 }
 0x890   :  { %v705_v41 = vadd.f32 1.0, %v1154_v39 }
 0x891   :  { %714 = vrot.lane.b32.xlu0 %v712_v33, %s1196_s3 }
 0x892   :  { %1155 = vrcp.f32 %v705_v41 }
 0x89f   :  { %v1156_v45 = vpop.eup %1155 }
 0x903   :  { %v715_v42 = vpop.permute.xlu0 %714 }
 0x904   :  { %v717_v44 = vadd.f32 %v715_v42, %v711_v35  ;;  %v954_v42 = vld [vmem:[#allocation2 + $0x18] sm:$0xc0] }
 0x906   :  { %1157 = vtanh.f32 %v717_v44 }
 0x913   :  { %v1158_v46 = vpop.eup %1157 }
 0x914   :  { %v719_v47 = vmul.f32 %v1158_v46, %v1156_v45 }
 0x916   :  { %721 = vrot.lane.b32.xlu1 %v719_v47, %s1196_s3 }
 0x988   :  { %v722_v48 = vpop.permute.xlu1 %721 }
 0x989   :  { %724 = vst.msk [vmem:[%s1634_s4 + $0x8] sm:$0x3] %vm265_vm0, %v722_v48  ;;  %1088 = vmatmul.mubr.msk.f32.vlgmr.msra.gmra.mxu1 %vm162_vm1, %v722_v48  ;;  %v955_v48 = vld [vmem:[#allocation2 + $0x8] sm:$0xc0] }
 0x98a   :  { %978 = vmatpush1.msra.mxu1 %v1269_v14  ;;  %1025 = vmatprep.mubr.f32.mxu1 %v1195_v3 }
 0x98b   :  { %979 = vmatprep.subr.mxu1 %v1274_v15  ;;  %v725_v15 = vld [vmem:[#allocation2 + $0x18] sm:$0xc] }
 0x98c   :  { %980 = vmatpush1.msra.mxu1 %v1283_v17 }
 0x98d   :  { %981 = vmatprep.subr.mxu1 %v1292_v19 }
 0x98e   :  { %982 = vmatpush1.msra.mxu1 %v1297_v20 }
 0x98f   :  { %983 = vmatprep.subr.mxu1 %v1306_v22 }
 0x990   :  { %984 = vmatpush1.msra.mxu1 %v1315_v24  ;;  %v726_v24 = vld [vmem:[#allocation2 + $0x8] sm:$0xc] }
 0x991   :  { %985 = vmatprep.subr.mxu1 %v1324_v26 }
 0x992   :  { %986 = vmatpush1.msra.mxu1 %v1333_v28 }
 0x993   :  { %987 = vmatprep.subr.mxu1 %v1342_v30 }
 0x994   :  { %988 = vmatpush1.msra.mxu1 %v1351_v32 }
 0x995   :  { %989 = vmatprep.subr.mxu1 %v1360_v34  ;;  %v822_v34 = vrot.slane %v717_v44, 6 }
 0x996   :  { %990 = vmatpush1.msra.mxu1 %v1369_v36 }
 0x997   :  { %991 = vmatprep.subr.mxu1 %v1378_v38 }
 0x998   :  { %992 = vmatpush1.msra.mxu1 %v1387_v40 }
 0xa49   :  { %v795_v3 = vpop.f32.mrf.mxu1 }
 0xa4a   :  { %v802_v14 = vrot.slane %v795_v3, 6 }
 0xa4b   :  { %v797_v20 = vpop.f32.mrf.mxu1 }
 0xa4c   :  { %v806_v17 = vadd.f32 %v802_v14, %v725_v15  ;;  %v803_v22 = vrot.slane %v797_v20, 6 }
 0xa4e   :  { %v1089_v19 = vmul.f32 -1.442695, %v806_v17  ;;  %v807_v26 = vadd.f32 %v803_v22, %v726_v24 }
 0xa50   :  { %1159 = vpow2.f32 %v1089_v19  ;;  %v1090_v40 = vmul.f32 -1.442695, %v807_v26 }
 0xa51   :  { %1161 = vtanh.f32 %v807_v26 }
 0xa5d   :  { %v1160_v28 = vpop.eup %1159 }
 0xa5e   :  { %v811_v30 = vadd.f32 1.0, %v1160_v28  ;;  %v1162_v32 = vpop.eup %1161 }
 0xa60   :  { %1163 = vrcp.f32 %v811_v30 }
 0xa61   :  { %1165 = vpow2.f32 %v1090_v40 }
 0xa6d   :  { %v1164_v36 = vpop.eup %1163 }
 0xa6e   :  { %v825_v38 = vmul.f32 %v1164_v36, %v1162_v32  ;;  %v824_v49 = vmul.f32 %v1164_v36, %v822_v34  ;;  %v1166_v50 = vpop.eup %1165 }
 0xa6f   :  { %v818_v51 = vadd.f32 1.0, %v1166_v50 }
 0xa70   :  { %827 = vrot.lane.b32.xlu0 %v825_v38, %s1196_s3 }
 0xa71   :  { %1167 = vrcp.f32 %v818_v51 }
 0xa7e   :  { %v1168_v54 = vpop.eup %1167 }
 0xae2   :  { %v828_v52 = vpop.permute.xlu0 %827 }
 0xae3   :  { %v830_v53 = vadd.f32 %v828_v52, %v824_v49 }
 0xae5   :  { %1169 = vtanh.f32 %v830_v53  ;;  %v938_v9 = vrot.slane %v830_v53, 6 }
 0xaf2   :  { %v1170_v57 = vpop.eup %1169 }
 0xaf3   :  { %v1587_v58 = vmul.f32 %v1170_v57, %v1168_v54 }
 0xaf5   :  { %v840_v59 = vrot.slane %v1587_v58, 2 }
 0xaf7   :  { %841 = vrot.lane.b32.xlu1 %v840_v59, %s1196_s3 }
 0xb69   :  { %v842_v60 = vpop.permute.xlu1 %841 }
 0xb6a   :  { %1091 = vmatmul.mubr.msk.f32.vlgmr.msra.gmra.mxu0 %vm162_vm1, %v842_v60 }
 0xc2a   :  { %v911_v61 = vpop.f32.mrf.mxu0 }
 0xc2b   :  { %v918_v63 = vrot.slane %v911_v61, 4 }
 0xc2c   :  { %v913_v2 = vpop.f32.mrf.mxu0 }
 0xc2d   :  { %v922_v12 = vadd.f32 %v918_v63, %v838_v0  ;;  %v919_v4 = vrot.slane %v913_v2, 4 }
 0xc2f   :  { %v1092_v1 = vmul.f32 -1.442695, %v922_v12  ;;  %v923_v55 = vadd.f32 %v919_v4, %v839_v5 }
 0xc31   :  { %1171 = vpow2.f32 %v1092_v1  ;;  %v1093_v16 = vmul.f32 -1.442695, %v923_v55 }
 0xc32   :  { %1173 = vtanh.f32 %v923_v55 }
 0xc3e   :  { %v1172_v56 = vpop.eup %1171 }
 0xc3f   :  { %v927_v7 = vadd.f32 1.0, %v1172_v56  ;;  %v1174_v8 = vpop.eup %1173 }
 0xc41   :  { %1175 = vrcp.f32 %v927_v7 }
 0xc42   :  { %1177 = vpow2.f32 %v1093_v16 }
 0xc4e   :  { %v1176_v10 = vpop.eup %1175 }
 0xc4f   :  { %v941_v11 = vmul.f32 %v1176_v10, %v1174_v8  ;;  %v940_v13 = vmul.f32 %v1176_v10, %v938_v9  ;;  %v1178_v18 = vpop.eup %1177 }
 0xc50   :  { %v934_v21 = vadd.f32 1.0, %v1178_v18 }
 0xc51   :  { %943 = vrot.lane.b32.xlu0 %v941_v11, %s1196_s3 }
 0xc52   :  { %1179 = vrcp.f32 %v934_v21 }
 0xc5f   :  { %v1180_v27 = vpop.eup %1179 }
 0xcc3   :  { %v944_v23 = vpop.permute.xlu0 %943 }
 0xcc4   :  { %v946_v25 = vadd.f32 %v944_v23, %v940_v13 }
 0xcc6   :  { %1181 = vtanh.f32 %v946_v25  ;;  %v1054_v19 = vrot.slane %v946_v25, 6 }
 0xcd3   :  { %v1182_v29 = vpop.eup %1181 }
 0xcd4   :  { %v948_v31 = vmul.f32 %v1182_v29, %v1180_v27 }
 0xcd6   :  { %v956_v33 = vrot.slane %v948_v31, 4 }
 0xcd8   :  { %957 = vrot.lane.b32.xlu1 %v956_v33, %s1196_s3 }
 0xcdc   :  { %376 = vrot.lane.b32.xlu1 %v1494_v62, %s1196_s3 }
 0xce0   :  { %610 = vrot.lane.b32.xlu1 %v1542_v6, %s1196_s3 }
 0xce4   :  { %950 = vrot.lane.b32.xlu1 %v948_v31, %s1196_s3 }
 0xd4a   :  { %v958_v35 = vpop.permute.xlu1 %957 }
 0xd4b   :  { %1094 = vmatmul.mubr.msk.f32.vlgmr.msra.gmra.mxu1 %vm162_vm1, %v958_v35 }
 0xd4e   :  { %v377_v37 = vpop.permute.xlu1 %376 }
 0xd4f   :  { %380 = vst.msk [vmem:[%s1634_s4] sm:$0xc] %vm379_vm2, %v377_v37 }
 0xd52   :  { %v611_v39 = vpop.permute.xlu1 %610 }
 0xd53   :  { %614 = vst.msk [vmem:[%s1634_s4] sm:$0xc0] %vm613_vm3, %v611_v39 }
 0xd56   :  { %v951_v62 = vpop.permute.xlu1 %950 }
 0xd57   :  { %953 = vst.msk [vmem:[%s1634_s4 + $0x8] sm:$0x30] %vm496_vm4, %v951_v62 }
 0xe0b   :  { %v1027_v6 = vpop.f32.mrf.mxu1 }
 0xe0c   :  { %v1034_v41 = vrot.slane %v1027_v6, 2 }
 0xe0d   :  { %v1029_v46 = vpop.f32.mrf.mxu1 }
 0xe0e   :  { %v1038_v44 = vadd.f32 %v1034_v41, %v954_v42  ;;  %v1035_v47 = vrot.slane %v1029_v46, 2 }
 0xe10   :  { %v1095_v45 = vmul.f32 -1.442695, %v1038_v44  ;;  %v1039_v3 = vadd.f32 %v1035_v47, %v955_v48 }
 0xe12   :  { %1183 = vpow2.f32 %v1095_v45  ;;  %v1096_v26 = vmul.f32 -1.442695, %v1039_v3 }
 0xe13   :  { %1185 = vtanh.f32 %v1039_v3 }
 0xe1f   :  { %v1184_v14 = vpop.eup %1183 }
 0xe20   :  { %v1043_v15 = vadd.f32 1.0, %v1184_v14  ;;  %v1186_v17 = vpop.eup %1185 }
 0xe22   :  { %1187 = vrcp.f32 %v1043_v15 }
 0xe23   :  { %1189 = vpow2.f32 %v1096_v26 }
 0xe2f   :  { %v1188_v20 = vpop.eup %1187 }
 0xe30   :  { %v1057_v22 = vmul.f32 %v1188_v20, %v1186_v17  ;;  %v1056_v24 = vmul.f32 %v1188_v20, %v1054_v19  ;;  %v1190_v28 = vpop.eup %1189 }
 0xe31   :  { %v1050_v30 = vadd.f32 1.0, %v1190_v28 }
 0xe32   :  { %1059 = vrot.lane.b32.xlu0 %v1057_v22, %s1196_s3 }
 0xe33   :  { %1191 = vrcp.f32 %v1050_v30 }
 0xe36   :  { %493 = vrot.lane.b32.xlu0 %v1519_v43, %s1196_s3 }
 0xe3a   :  { %834 = vrot.lane.b32.xlu0 %v1587_v58, %s1196_s3 }
 0xe40   :  { %v1192_v43 = vpop.eup %1191 }
 0xea4   :  { %v1060_v32 = vpop.permute.xlu0 %1059 }
 0xea5   :  { %v1062_v34 = vadd.f32 %v1060_v32, %v1056_v24 }
 0xea7   :  { %1193 = vtanh.f32 %v1062_v34 }
 0xea8   :  { %v494_v36 = vpop.permute.xlu0 %493 }
 0xea9   :  { %497 = vst.msk [vmem:[%s1634_s4] sm:$0x30] %vm496_vm4, %v494_v36 }
 0xeac   :  { %v835_v38 = vpop.permute.xlu0 %834 }
 0xead   :  { %837 = vst.msk [vmem:[%s1634_s4 + $0x8] sm:$0xc] %vm379_vm2, %v835_v38 }
 0xeb4   :  { %v1194_v49 = vpop.eup %1193 }
 0xeb5   :  { %v1064_v40 = vmul.f32 %v1194_v49, %v1192_v43 }
 0xeb7   :  { %1066 = vrot.lane.b32.xlu0 %v1064_v40, %s1196_s3 }
 0xf29   :  { %v1067_v50 = vpop.permute.xlu0 %1066 }
 0xf2a   :  { %1069 = vst.msk [vmem:[%s1634_s4 + $0x8] sm:$0xc0] %vm613_vm3, %v1067_v50 }

</bundles_post_ra>
